<compile_context>
chip_gen: v6e
topology: v6e:2x2x1
jax: 0.10.0
libtpu: 0.0.40
codegen_flags: <defaults>
</compile_context>

<pallas_src>
import functools

import jax
import jax.numpy as jnp
from jax.experimental import pallas as pl
from jax.experimental.pallas import tpu as pltpu


# ----------------------------------------------------------------------------
# One GATEConv + BatchNorm1d (batch stats) + ReLU on in-VMEM/vreg values.
# ----------------------------------------------------------------------------
def _gate_layer(x, mask, ew, ae_ref, li, w_all, bias, gamma, beta,
                *, heads, cout, n):
    # Single MXU push for head features AND both attention terms.
    xb = x.astype(jnp.bfloat16)
    hq = jnp.dot(xb, w_all, preferred_element_type=jnp.float32)  # [N, h*Cout + 2h]
    hf_all = hq[:, :heads * cout]                                # [N, heads*Cout]
    qa = hq[:, heads * cout:heads * cout + heads]                # [N, heads] (dst term)
    ka_t = hq[:, heads * cout + heads:heads * cout + 2 * heads].T  # [heads, N] (src term)

    # Packed attention scores [N, heads*N]; heads is a small static int.
    s_blocks = []
    for h in range(heads):
        ae_h = ae_ref[li * heads + h]                            # SMEM scalar
        raw = qa[:, h:h + 1] + ka_t[h:h + 1, :] + ew * ae_h
        lrelu = jnp.maximum(raw, 0.2 * raw)                      # LeakyReLU, 2 VALU ops
        # Single mask: exp(-1e30 - m) underflows to 0, no extra `* adj` later.
        # Zero-in-degree rows degrade to a uniform average instead of NaN.
        s_blocks.append(jnp.where(mask, lrelu, -1e30))
    s = jnp.concatenate(s_blocks, axis=1)                        # [N, heads*N]

    # One shared per-row max across heads (numerically safe: m >= per-head max).
    m = jnp.max(s, axis=1, keepdims=True)
    p = jnp.exp(s - m)                                           # [N, heads*N] f32

    # Pre-scale each head block by 1/denom * 1/heads (EUP reciprocal), then a
    # SINGLE wider-K MXU dot for all heads.
    inv_heads = 1.0 / float(heads)
    p_blocks, hf_blocks = [], []
    for h in range(heads):
        ph = p[:, h * n:(h + 1) * n]
        denom = jnp.sum(ph, axis=1, keepdims=True)               # >= 1 if row has edges
        scale = pl.reciprocal(denom, approx=True) * inv_heads
        p_blocks.append((ph * scale).astype(jnp.bfloat16))
        hf_blocks.append(hf_all[:, h * cout:(h + 1) * cout])
    p_packed = jnp.concatenate(p_blocks, axis=1)                         # [N, heads*N] bf16
    hf_packed = jnp.concatenate(hf_blocks, axis=0).astype(jnp.bfloat16)  # [heads*N, Cout] bf16

    y = jnp.dot(p_packed, hf_packed, preferred_element_type=jnp.float32) + bias

    # BatchNorm1d with training-mode batch statistics (biased var) + ReLU,
    # folded to a single multiply-add; statistics stay in f32.
    mean = jnp.sum(y, axis=0, keepdims=True) * (1.0 / n)
    yc = y - mean
    var = jnp.sum(yc * yc, axis=0, keepdims=True) * (1.0 / n)
    sc = gamma * jax.lax.rsqrt(var + 1e-5)
    return jnp.maximum(yc * sc + beta, 0.0)


# ----------------------------------------------------------------------------
# Fused whole-network kernel (one grid step = one independent graph problem)
# ----------------------------------------------------------------------------
def gate_fused_kernel(ae_ref, x_ref, ge_ref, pool_ref, wslab_ref, vslab_ref,
                      o_ref, *, heads, cins, couts, w_offs, lin_off, out_c):
    n = x_ref.shape[0]
    x = x_ref[...]                      # [N, Cin] f32
    mask = ge_ref[0] > 0.0              # [N, N], computed once, reused by all layers/heads
    ew = ge_ref[1]                      # [N, N]

    for li in range(3):
        cin, cout = cins[li], couts[li]
        w_all = wslab_ref[w_offs[li]:w_offs[li] + cin,
                          :heads * cout + 2 * heads]             # bf16 [Cin, h*Cout+2h]
        bias = vslab_ref[3 * li + 0:3 * li + 1, :cout]
        gamma = vslab_ref[3 * li + 1:3 * li + 2, :cout]
        beta = vslab_ref[3 * li + 2:3 * li + 3, :cout]
        x = _gate_layer(x, mask, ew, ae_ref, li, w_all, bias, gamma, beta,
                        heads=heads, cout=cout, n=n)

    # global_mean_pool (normalized one-hot matmul) + Linear + softmax(dim=1)
    h3 = couts[2]
    pooled = jnp.dot(pool_ref[...], x.astype(jnp.bfloat16),
                     preferred_element_type=jnp.float32)         # [G, H3]
    lw = wslab_ref[lin_off:lin_off + h3, :out_c]                 # bf16 [H3, OUT_C]
    lb = vslab_ref[3 * len(couts):3 * len(couts) + 1, :out_c]    # [1, OUT_C]
    logits = jnp.dot(pooled.astype(jnp.bfloat16), lw,
                     preferred_element_type=jnp.float32) + lb
    m = jnp.max(logits, axis=1, keepdims=True)
    e = jnp.exp(logits - m)
    o_ref[...] = e / jnp.sum(e, axis=1, keepdims=True)           # exact divide: rows sum to 1


# ----------------------------------------------------------------------------
# Host wrapper: param slab packing + pallas_call over a parallel batch grid
# ----------------------------------------------------------------------------
def gate_forward(x, adj, ew, pool_mat, params, *, heads):
    # x: [B, N, Cin], adj/ew: [B, N, N], pool_mat: [G, N]
    b, n, cin = x.shape
    g = pool_mat.shape[0]
    couts = tuple(params[f"conv{i}"]["bias"].shape[1] for i in (1, 2, 3))
    cins = (cin, couts[0], couts[1])
    out_c = params["lin_w"].shape[1]

    # ---- bf16 weight slab: [W|uatt] per layer + lin_w, padded to one width ----
    w_width = max(max(heads * c + 2 * heads for c in couts), out_c)
    blocks, w_offs, off = [], [], 0
    for li in (1, 2, 3):
        conv = params[f"conv{li}"]
        w_all = jnp.concatenate([conv["w"], conv["uatt"]], axis=1)
        w_all = jnp.pad(w_all, ((0, 0), (0, w_width - w_all.shape[1])))
        w_offs.append(off)
        off += w_all.shape[0]
        blocks.append(w_all)
    lin_off = off
    blocks.append(jnp.pad(params["lin_w"], ((0, 0), (0, w_width - out_c))))
    wslab = jnp.concatenate(blocks, axis=0).astype(jnp.bfloat16)

    # ---- f32 vector slab: (bias, gamma, beta) x 3 layers + lin_b ----
    v_width = max(max(couts), out_c)
    vrows = []
    for li in (1, 2, 3):
        conv = params[f"conv{li}"]
        gamma, beta = params[f"bn{li}"]
        for a in (conv["bias"], gamma, beta):
            vrows.append(jnp.pad(a, ((0, 0), (0, v_width - a.shape[1]))))
    vrows.append(jnp.pad(params["lin_b"], ((0, 0), (0, v_width - out_c))))
    vslab = jnp.concatenate(vrows, axis=0).astype(jnp.float32)

    # ---- flat 1-D SMEM scalars (edge-attention weights), via scalar prefetch ----
    ae_flat = jnp.concatenate([params[f"conv{i}"]["ae"] for i in (1, 2, 3)])  # [3*heads]

    # adj + ew combined into one per-graph tensor (one DMA per grid step).
    ge = jnp.stack([adj, ew], axis=1)                  # [B, 2, N, N]
    pool_bf16 = pool_mat.astype(jnp.bfloat16)          # MXU operand

    kern = functools.partial(gate_fused_kernel, heads=heads, cins=cins,
                             couts=couts, w_offs=tuple(w_offs),
                             lin_off=lin_off, out_c=out_c)

    grid_spec = pltpu.PrefetchScalarGridSpec(
        num_scalar_prefetch=1,
        grid=(b,),
        in_specs=[
            pl.BlockSpec((None, n, cin), lambda i, ae: (i, 0, 0)),       # x
            pl.BlockSpec((None, 2, n, n), lambda i, ae: (i, 0, 0, 0)),   # adj|ew
            pl.BlockSpec((g, n), lambda i, ae: (0, 0)),                  # pool (shared)
            pl.BlockSpec(wslab.shape, lambda i, ae: (0, 0)),             # bf16 weight slab
            pl.BlockSpec(vslab.shape, lambda i, ae: (0, 0)),             # f32 vector slab
        ],
        out_specs=pl.BlockSpec((None, g, out_c), lambda i, ae: (i, 0, 0)),
    )
    return pl.pallas_call(
        kern,
        out_shape=jax.ShapeDtypeStruct((b, g, out_c), jnp.float32),
        grid_spec=grid_spec,
        compiler_params=pltpu.CompilerParams(
            dimension_semantics=("parallel",)),
    )(ae_flat, x, ge, pool_bf16, wslab, vslab)


# ----------------------------------------------------------------------------
# Parameter init (deterministic, synthetic)
# ----------------------------------------------------------------------------
def init_gateconv(key, cin, cout, att, heads):
    k = jax.random.split(key, 6)
    w = 0.2 * jax.random.normal(k[0], (cin, heads * cout), jnp.float32)
    adst = 0.2 * jax.random.normal(k[1], (heads, cout, att), jnp.float32)
    asrc = 0.2 * jax.random.normal(k[2], (heads, cout, att), jnp.float32)
    av = 0.2 * jax.random.normal(k[3], (heads, att), jnp.float32)
    ae = 0.2 * jax.random.normal(k[4], (heads,), jnp.float32)
    bias = 0.1 * jax.random.normal(k[5], (1, cout), jnp.float32)

    # Linear contraction of the attention projections (exact, parameter glue).
    vdst = jnp.einsum("hca,ha->hc", adst, av)                 # [heads, cout]
    vsrc = jnp.einsum("hca,ha->hc", asrc, av)
    w3 = w.reshape(cin, heads, cout)
    udst = jnp.einsum("ihc,hc->hi", w3, vdst)                 # [heads, cin]
    usrc = jnp.einsum("ihc,hc->hi", w3, vsrc)                 # [heads, cin]
    # Packed so the kernel computes both attention terms (and hf) in one matmul:
    # x @ [w | uatt] -> [..., :h*Cout]=hf, [..., h*Cout:h*Cout+h]=dst, rest=src
    uatt = jnp.concatenate([udst, usrc], axis=0).T            # [cin, 2*heads]
    return dict(w=w, uatt=uatt, ae=ae, bias=bias)


def init_bn(key, c):
    k = jax.random.split(key, 2)
    gamma = 1.0 + 0.1 * jax.random.normal(k[0], (1, c), jnp.float32)
    beta = 0.1 * jax.random.normal(k[1], (1, c), jnp.float32)
    return gamma, beta


if __name__ == "__main__":
    # small config implied by the module
    IN_C, H1, H2, H3 = 8, 16, 16, 16
    ATT, HEADS, OUT_C = 8, 2, 4
    N, G = 16, 2          # 16 nodes per problem, 2 graphs of 8 nodes each
    B = 4                 # independent graph problems batched over the grid

    root = jax.random.PRNGKey(0)
    keys = jax.random.split(root, 11)

    # node features, per batched problem
    x = jax.random.normal(keys[0], (B, N, IN_C), jnp.float32)

    # dense graph: per-graph ring edges (both directions) + self loops
    adj_np = [[0.0] * N for _ in range(N)]
    per = N // G
    for gg in range(G):
        base = gg * per
        for i in range(per):
            dst = base + i
            adj_np[dst][dst] = 1.0
            adj_np[dst][base + (i + 1) % per] = 1.0
            adj_np[dst][base + (i - 1) % per] = 1.0
    adj1 = jnp.array(adj_np, jnp.float32)
    adj = jnp.broadcast_to(adj1, (B, N, N))
    ew = adj * jax.random.uniform(keys[1], (B, N, N), jnp.float32)

    # batch vector -> normalized one-hot pooling matrix [G, N]
    batch = jnp.repeat(jnp.arange(G), per)
    onehot = (batch[None, :] == jnp.arange(G)[:, None]).astype(jnp.float32)
    pool_mat = onehot / jnp.sum(onehot, axis=1, keepdims=True)

    params = {
        "conv1": init_gateconv(keys[2], IN_C, H1, ATT, HEADS),
        "conv2": init_gateconv(keys[3], H1, H2, ATT, HEADS),
        "conv3": init_gateconv(keys[4], H2, H3, ATT, HEADS),
        "bn1": init_bn(keys[5], H1),
        "bn2": init_bn(keys[6], H2),
        "bn3": init_bn(keys[7], H3),
        "lin_w": 0.2 * jax.random.normal(keys[8], (H3, OUT_C), jnp.float32),
        "lin_b": 0.1 * jax.random.normal(keys[9], (1, OUT_C), jnp.float32),
    }

    out = gate_forward(x, adj, ew, pool_mat, params, heads=HEADS)
    out = jax.block_until_ready(out)

    assert out.shape == (B, G, OUT_C)
    assert bool(jnp.all(jnp.isfinite(out)))
    # rows of a softmax must sum to 1
    assert bool(jnp.all(jnp.abs(jnp.sum(out, axis=-1) - 1.0) < 1e-5))
    print("KERNEL_OK")
</pallas_src>

<mosaic_0001>
module attributes {stable_mosaic.version = 11 : i64} {
  func.func @gate_fused_kernel(%arg0: i32, %arg1: memref<6xf32, #tpu.memory_space<smem>>, %arg2: memref<1x16x8xf32, #tpu.memory_space<vmem>>, %arg3: memref<1x2x16x16xf32, #tpu.memory_space<vmem>>, %arg4: memref<2x16xbf16, #tpu.memory_space<vmem>>, %arg5: memref<56x36xbf16, #tpu.memory_space<vmem>>, %arg6: memref<10x16xf32, #tpu.memory_space<vmem>>, %arg7: memref<1x2x4xf32, #tpu.memory_space<vmem>>) attributes {dimension_semantics = [#tpu.dimension_semantics<parallel>], iteration_bounds = array<i64: 4>, scalar_prefetch = 1 : i64, scratch_operands = 0 : i64, tpu.core_type = #tpu.core_type<tc>, window_params = [{transform_indices = @transform_0, window_bounds = array<i64: 1, 16, 8>}, {transform_indices = @transform_1, window_bounds = array<i64: 1, 2, 16, 16>}, {pipeline_mode = #tpu.pipeline_mode<synchronous>, transform_indices = @transform_2, window_bounds = array<i64: 2, 16>}, {pipeline_mode = #tpu.pipeline_mode<synchronous>, transform_indices = @transform_3, window_bounds = array<i64: 56, 36>}, {pipeline_mode = #tpu.pipeline_mode<synchronous>, transform_indices = @transform_4, window_bounds = array<i64: 10, 16>}, {transform_indices = @transform_5, window_bounds = array<i64: 1, 2, 4>}]} {
    %c0 = arith.constant 0 : index
    %c0_0 = arith.constant 0 : index
    %c0_1 = arith.constant 0 : index
    %0 = vector.load %arg2[%c0, %c0_0, %c0_1] : memref<1x16x8xf32, #tpu.memory_space<vmem>>, vector<1x16x8xf32>
    %1 = vector.shape_cast %0 : vector<1x16x8xf32> to vector<16x8xf32>
    %c0_2 = arith.constant 0 : index
    %c0_3 = arith.constant 0 : index
    %c0_4 = arith.constant 0 : index
    %c0_5 = arith.constant 0 : index
    %2 = vector.load %arg3[%c0_2, %c0_3, %c0_4, %c0_5] : memref<1x2x16x16xf32, #tpu.memory_space<vmem>>, vector<1x1x16x16xf32>
    %3 = vector.shape_cast %2 : vector<1x1x16x16xf32> to vector<16x16xf32>
    %cst = arith.constant 0.000000e+00 : f32
    %4 = vector.broadcast %cst : f32 to vector<16x16xf32>
    %5 = arith.cmpf ogt, %3, %4 : vector<16x16xf32>
    %c0_6 = arith.constant 0 : index
    %c1 = arith.constant 1 : index
    %c0_7 = arith.constant 0 : index
    %c0_8 = arith.constant 0 : index
    %6 = vector.load %arg3[%c0_6, %c1, %c0_7, %c0_8] : memref<1x2x16x16xf32, #tpu.memory_space<vmem>>, vector<1x1x16x16xf32>
    %7 = vector.shape_cast %6 : vector<1x1x16x16xf32> to vector<16x16xf32>
    %c0_9 = arith.constant 0 : index
    %c0_10 = arith.constant 0 : index
    %8 = vector.load %arg5[%c0_9, %c0_10] : memref<56x36xbf16, #tpu.memory_space<vmem>>, vector<8x36xbf16>
    %c0_11 = arith.constant 0 : index
    %c0_12 = arith.constant 0 : index
    %9 = vector.load %arg6[%c0_11, %c0_12] : memref<10x16xf32, #tpu.memory_space<vmem>>, vector<1x16xf32>
    %c1_13 = arith.constant 1 : index
    %c0_14 = arith.constant 0 : index
    %10 = vector.load %arg6[%c1_13, %c0_14] : memref<10x16xf32, #tpu.memory_space<vmem>>, vector<1x16xf32>
    %c2 = arith.constant 2 : index
    %c0_15 = arith.constant 0 : index
    %11 = vector.load %arg6[%c2, %c0_15] : memref<10x16xf32, #tpu.memory_space<vmem>>, vector<1x16xf32>
    %12 = arith.truncf %1 : vector<16x8xf32> to vector<16x8xbf16>
    %cst_16 = arith.constant dense<0.000000e+00> : vector<16x36xf32>
    %13 = tpu.matmul %12, %8, %cst_16 {dimension_numbers = #tpu.dot_dimension_numbers<[1], [0], [0], [1], [0, 0, 1, 1], [], []>} : vector<16x8xbf16>, vector<8x36xbf16>, vector<16x36xf32> -> vector<16x36xf32>
    %14 = vector.extract_strided_slice %13 {offsets = [0, 0], sizes = [16, 32], strides = [1, 1]} : vector<16x36xf32> to vector<16x32xf32>
    %15 = vector.extract_strided_slice %13 {offsets = [0, 32], sizes = [16, 2], strides = [1, 1]} : vector<16x36xf32> to vector<16x2xf32>
    %16 = vector.extract_strided_slice %13 {offsets = [0, 34], sizes = [16, 2], strides = [1, 1]} : vector<16x36xf32> to vector<16x2xf32>
    %17 = tpu.transpose %16, [1, 0] : vector<16x2xf32> -> vector<2x16xf32>
    %c0_17 = arith.constant 0 : index
    %18 = memref.load %arg1[%c0_17] : memref<6xf32, #tpu.memory_space<smem>>
    %19 = vector.extract_strided_slice %15 {offsets = [0, 0], sizes = [16, 1], strides = [1, 1]} : vector<16x2xf32> to vector<16x1xf32>
    %20 = vector.extract_strided_slice %17 {offsets = [0, 0], sizes = [1, 16], strides = [1, 1]} : vector<2x16xf32> to vector<1x16xf32>
    %21 = vector.broadcast %19 : vector<16x1xf32> to vector<16x16xf32>
    %22 = vector.broadcast %20 : vector<1x16xf32> to vector<16x16xf32>
    %23 = arith.addf %21, %22 : vector<16x16xf32>
    %24 = vector.broadcast %18 : f32 to vector<16x16xf32>
    %25 = arith.mulf %7, %24 : vector<16x16xf32>
    %26 = arith.addf %23, %25 : vector<16x16xf32>
    %cst_18 = arith.constant 2.000000e-01 : f32
    %27 = vector.broadcast %cst_18 : f32 to vector<16x16xf32>
    %28 = arith.mulf %27, %26 : vector<16x16xf32>
    %29 = arith.maximumf %26, %28 : vector<16x16xf32>
    %cst_19 = arith.constant -1.000000e+30 : f32
    %30 = vector.broadcast %cst_19 : f32 to vector<16x16xf32>
    %31 = arith.select %5, %29, %30 : vector<16x16xi1>, vector<16x16xf32>
    %c1_20 = arith.constant 1 : index
    %32 = memref.load %arg1[%c1_20] : memref<6xf32, #tpu.memory_space<smem>>
    %33 = vector.extract_strided_slice %15 {offsets = [0, 1], sizes = [16, 1], strides = [1, 1]} : vector<16x2xf32> to vector<16x1xf32>
    %34 = vector.extract_strided_slice %17 {offsets = [1, 0], sizes = [1, 16], strides = [1, 1]} : vector<2x16xf32> to vector<1x16xf32>
    %35 = vector.broadcast %33 : vector<16x1xf32> to vector<16x16xf32>
    %36 = vector.broadcast %34 : vector<1x16xf32> to vector<16x16xf32>
    %37 = arith.addf %35, %36 : vector<16x16xf32>
    %38 = vector.broadcast %32 : f32 to vector<16x16xf32>
    %39 = arith.mulf %7, %38 : vector<16x16xf32>
    %40 = arith.addf %37, %39 : vector<16x16xf32>
    %cst_21 = arith.constant 2.000000e-01 : f32
    %41 = vector.broadcast %cst_21 : f32 to vector<16x16xf32>
    %42 = arith.mulf %41, %40 : vector<16x16xf32>
    %43 = arith.maximumf %40, %42 : vector<16x16xf32>
    %cst_22 = arith.constant -1.000000e+30 : f32
    %44 = vector.broadcast %cst_22 : f32 to vector<16x16xf32>
    %45 = arith.select %5, %43, %44 : vector<16x16xi1>, vector<16x16xf32>
    %46 = tpu.concatenate %31, %45 in 1 : vector<16x16xf32>, vector<16x16xf32> -> vector<16x32xf32>
    %cst_23 = arith.constant dense<0xFF800000> : vector<16xf32>
    %47 = vector.multi_reduction <maximumf>, %46, %cst_23 [1] : vector<16x32xf32> to vector<16xf32>
    %48 = vector.shape_cast %47 : vector<16xf32> to vector<16x1xf32>
    %49 = vector.broadcast %48 : vector<16x1xf32> to vector<16x32xf32>
    %50 = arith.subf %46, %49 : vector<16x32xf32>
    %51 = math.exp %50 : vector<16x32xf32>
    %52 = vector.extract_strided_slice %51 {offsets = [0, 0], sizes = [16, 16], strides = [1, 1]} : vector<16x32xf32> to vector<16x16xf32>
    %cst_24 = arith.constant dense<0.000000e+00> : vector<16xf32>
    %53 = vector.multi_reduction <add>, %52, %cst_24 [1] : vector<16x16xf32> to vector<16xf32>
    %54 = vector.shape_cast %53 : vector<16xf32> to vector<16x1xf32>
    %55 = tpu.reciprocal %54 {approx = true} : vector<16x1xf32> -> vector<16x1xf32>
    %cst_25 = arith.constant 5.000000e-01 : f32
    %56 = vector.broadcast %cst_25 : f32 to vector<16x1xf32>
    %57 = arith.mulf %55, %56 : vector<16x1xf32>
    %58 = vector.broadcast %57 : vector<16x1xf32> to vector<16x16xf32>
    %59 = arith.mulf %52, %58 : vector<16x16xf32>
    %60 = arith.truncf %59 : vector<16x16xf32> to vector<16x16xbf16>
    %61 = vector.extract_strided_slice %14 {offsets = [0, 0], sizes = [16, 16], strides = [1, 1]} : vector<16x32xf32> to vector<16x16xf32>
    %62 = vector.extract_strided_slice %51 {offsets = [0, 16], sizes = [16, 16], strides = [1, 1]} : vector<16x32xf32> to vector<16x16xf32>
    %cst_26 = arith.constant dense<0.000000e+00> : vector<16xf32>
    %63 = vector.multi_reduction <add>, %62, %cst_26 [1] : vector<16x16xf32> to vector<16xf32>
    %64 = vector.shape_cast %63 : vector<16xf32> to vector<16x1xf32>
    %65 = tpu.reciprocal %64 {approx = true} : vector<16x1xf32> -> vector<16x1xf32>
    %cst_27 = arith.constant 5.000000e-01 : f32
    %66 = vector.broadcast %cst_27 : f32 to vector<16x1xf32>
    %67 = arith.mulf %65, %66 : vector<16x1xf32>
    %68 = vector.broadcast %67 : vector<16x1xf32> to vector<16x16xf32>
    %69 = arith.mulf %62, %68 : vector<16x16xf32>
    %70 = arith.truncf %69 : vector<16x16xf32> to vector<16x16xbf16>
    %71 = vector.extract_strided_slice %14 {offsets = [0, 16], sizes = [16, 16], strides = [1, 1]} : vector<16x32xf32> to vector<16x16xf32>
    %72 = tpu.concatenate %60, %70 in 1 : vector<16x16xbf16>, vector<16x16xbf16> -> vector<16x32xbf16>
    %73 = tpu.concatenate %61, %71 in 0 : vector<16x16xf32>, vector<16x16xf32> -> vector<32x16xf32>
    %74 = arith.truncf %73 : vector<32x16xf32> to vector<32x16xbf16>
    %cst_28 = arith.constant dense<0.000000e+00> : vector<16x16xf32>
    %75 = tpu.matmul %72, %74, %cst_28 {dimension_numbers = #tpu.dot_dimension_numbers<[1], [0], [0], [1], [0, 0, 1, 1], [], []>} : vector<16x32xbf16>, vector<32x16xbf16>, vector<16x16xf32> -> vector<16x16xf32>
    %76 = vector.broadcast %9 : vector<1x16xf32> to vector<16x16xf32>
    %77 = arith.addf %75, %76 : vector<16x16xf32>
    %cst_29 = arith.constant dense<0.000000e+00> : vector<16xf32>
    %78 = vector.multi_reduction <add>, %77, %cst_29 [0] : vector<16x16xf32> to vector<16xf32>
    %79 = vector.shape_cast %78 : vector<16xf32> to vector<1x16xf32>
    %cst_30 = arith.constant 6.250000e-02 : f32
    %80 = vector.broadcast %cst_30 : f32 to vector<1x16xf32>
    %81 = arith.mulf %79, %80 : vector<1x16xf32>
    %82 = vector.broadcast %81 : vector<1x16xf32> to vector<16x16xf32>
    %83 = arith.subf %77, %82 : vector<16x16xf32>
    %84 = arith.mulf %83, %83 : vector<16x16xf32>
    %cst_31 = arith.constant dense<0.000000e+00> : vector<16xf32>
    %85 = vector.multi_reduction <add>, %84, %cst_31 [0] : vector<16x16xf32> to vector<16xf32>
    %86 = vector.shape_cast %85 : vector<16xf32> to vector<1x16xf32>
    %cst_32 = arith.constant 6.250000e-02 : f32
    %87 = vector.broadcast %cst_32 : f32 to vector<1x16xf32>
    %88 = arith.mulf %86, %87 : vector<1x16xf32>
    %cst_33 = arith.constant 9.99999974E-6 : f32
    %89 = vector.broadcast %cst_33 : f32 to vector<1x16xf32>
    %90 = arith.addf %88, %89 : vector<1x16xf32>
    %91 = math.rsqrt %90 : vector<1x16xf32>
    %92 = arith.mulf %10, %91 : vector<1x16xf32>
    %93 = vector.broadcast %92 : vector<1x16xf32> to vector<16x16xf32>
    %94 = arith.mulf %83, %93 : vector<16x16xf32>
    %95 = vector.broadcast %11 : vector<1x16xf32> to vector<16x16xf32>
    %96 = arith.addf %94, %95 : vector<16x16xf32>
    %cst_34 = arith.constant 0.000000e+00 : f32
    %97 = vector.broadcast %cst_34 : f32 to vector<16x16xf32>
    %98 = arith.maximumf %96, %97 : vector<16x16xf32>
    %c8 = arith.constant 8 : index
    %c0_35 = arith.constant 0 : index
    %99 = vector.load %arg5[%c8, %c0_35] : memref<56x36xbf16, #tpu.memory_space<vmem>>, vector<16x36xbf16>
    %c3 = arith.constant 3 : index
    %c0_36 = arith.constant 0 : index
    %100 = vector.load %arg6[%c3, %c0_36] : memref<10x16xf32, #tpu.memory_space<vmem>>, vector<1x16xf32>
    %c4 = arith.constant 4 : index
    %c0_37 = arith.constant 0 : index
    %101 = vector.load %arg6[%c4, %c0_37] : memref<10x16xf32, #tpu.memory_space<vmem>>, vector<1x16xf32>
    %c5 = arith.constant 5 : index
    %c0_38 = arith.constant 0 : index
    %102 = vector.load %arg6[%c5, %c0_38] : memref<10x16xf32, #tpu.memory_space<vmem>>, vector<1x16xf32>
    %103 = arith.truncf %98 : vector<16x16xf32> to vector<16x16xbf16>
    %cst_39 = arith.constant dense<0.000000e+00> : vector<16x36xf32>
    %104 = tpu.matmul %103, %99, %cst_39 {dimension_numbers = #tpu.dot_dimension_numbers<[1], [0], [0], [1], [0, 0, 1, 1], [], []>} : vector<16x16xbf16>, vector<16x36xbf16>, vector<16x36xf32> -> vector<16x36xf32>
    %105 = vector.extract_strided_slice %104 {offsets = [0, 0], sizes = [16, 32], strides = [1, 1]} : vector<16x36xf32> to vector<16x32xf32>
    %106 = vector.extract_strided_slice %104 {offsets = [0, 32], sizes = [16, 2], strides = [1, 1]} : vector<16x36xf32> to vector<16x2xf32>
    %107 = vector.extract_strided_slice %104 {offsets = [0, 34], sizes = [16, 2], strides = [1, 1]} : vector<16x36xf32> to vector<16x2xf32>
    %108 = tpu.transpose %107, [1, 0] : vector<16x2xf32> -> vector<2x16xf32>
    %c2_40 = arith.constant 2 : index
    %109 = memref.load %arg1[%c2_40] : memref<6xf32, #tpu.memory_space<smem>>
    %110 = vector.extract_strided_slice %106 {offsets = [0, 0], sizes = [16, 1], strides = [1, 1]} : vector<16x2xf32> to vector<16x1xf32>
    %111 = vector.extract_strided_slice %108 {offsets = [0, 0], sizes = [1, 16], strides = [1, 1]} : vector<2x16xf32> to vector<1x16xf32>
    %112 = vector.broadcast %110 : vector<16x1xf32> to vector<16x16xf32>
    %113 = vector.broadcast %111 : vector<1x16xf32> to vector<16x16xf32>
    %114 = arith.addf %112, %113 : vector<16x16xf32>
    %115 = vector.broadcast %109 : f32 to vector<16x16xf32>
    %116 = arith.mulf %7, %115 : vector<16x16xf32>
    %117 = arith.addf %114, %116 : vector<16x16xf32>
    %cst_41 = arith.constant 2.000000e-01 : f32
    %118 = vector.broadcast %cst_41 : f32 to vector<16x16xf32>
    %119 = arith.mulf %118, %117 : vector<16x16xf32>
    %120 = arith.maximumf %117, %119 : vector<16x16xf32>
    %cst_42 = arith.constant -1.000000e+30 : f32
    %121 = vector.broadcast %cst_42 : f32 to vector<16x16xf32>
    %122 = arith.select %5, %120, %121 : vector<16x16xi1>, vector<16x16xf32>
    %c3_43 = arith.constant 3 : index
    %123 = memref.load %arg1[%c3_43] : memref<6xf32, #tpu.memory_space<smem>>
    %124 = vector.extract_strided_slice %106 {offsets = [0, 1], sizes = [16, 1], strides = [1, 1]} : vector<16x2xf32> to vector<16x1xf32>
    %125 = vector.extract_strided_slice %108 {offsets = [1, 0], sizes = [1, 16], strides = [1, 1]} : vector<2x16xf32> to vector<1x16xf32>
    %126 = vector.broadcast %124 : vector<16x1xf32> to vector<16x16xf32>
    %127 = vector.broadcast %125 : vector<1x16xf32> to vector<16x16xf32>
    %128 = arith.addf %126, %127 : vector<16x16xf32>
    %129 = vector.broadcast %123 : f32 to vector<16x16xf32>
    %130 = arith.mulf %7, %129 : vector<16x16xf32>
    %131 = arith.addf %128, %130 : vector<16x16xf32>
    %cst_44 = arith.constant 2.000000e-01 : f32
    %132 = vector.broadcast %cst_44 : f32 to vector<16x16xf32>
    %133 = arith.mulf %132, %131 : vector<16x16xf32>
    %134 = arith.maximumf %131, %133 : vector<16x16xf32>
    %cst_45 = arith.constant -1.000000e+30 : f32
    %135 = vector.broadcast %cst_45 : f32 to vector<16x16xf32>
    %136 = arith.select %5, %134, %135 : vector<16x16xi1>, vector<16x16xf32>
    %137 = tpu.concatenate %122, %136 in 1 : vector<16x16xf32>, vector<16x16xf32> -> vector<16x32xf32>
    %cst_46 = arith.constant dense<0xFF800000> : vector<16xf32>
    %138 = vector.multi_reduction <maximumf>, %137, %cst_46 [1] : vector<16x32xf32> to vector<16xf32>
    %139 = vector.shape_cast %138 : vector<16xf32> to vector<16x1xf32>
    %140 = vector.broadcast %139 : vector<16x1xf32> to vector<16x32xf32>
    %141 = arith.subf %137, %140 : vector<16x32xf32>
    %142 = math.exp %141 : vector<16x32xf32>
    %143 = vector.extract_strided_slice %142 {offsets = [0, 0], sizes = [16, 16], strides = [1, 1]} : vector<16x32xf32> to vector<16x16xf32>
    %cst_47 = arith.constant dense<0.000000e+00> : vector<16xf32>
    %144 = vector.multi_reduction <add>, %143, %cst_47 [1] : vector<16x16xf32> to vector<16xf32>
    %145 = vector.shape_cast %144 : vector<16xf32> to vector<16x1xf32>
    %146 = tpu.reciprocal %145 {approx = true} : vector<16x1xf32> -> vector<16x1xf32>
    %cst_48 = arith.constant 5.000000e-01 : f32
    %147 = vector.broadcast %cst_48 : f32 to vector<16x1xf32>
    %148 = arith.mulf %146, %147 : vector<16x1xf32>
    %149 = vector.broadcast %148 : vector<16x1xf32> to vector<16x16xf32>
    %150 = arith.mulf %143, %149 : vector<16x16xf32>
    %151 = arith.truncf %150 : vector<16x16xf32> to vector<16x16xbf16>
    %152 = vector.extract_strided_slice %105 {offsets = [0, 0], sizes = [16, 16], strides = [1, 1]} : vector<16x32xf32> to vector<16x16xf32>
    %153 = vector.extract_strided_slice %142 {offsets = [0, 16], sizes = [16, 16], strides = [1, 1]} : vector<16x32xf32> to vector<16x16xf32>
    %cst_49 = arith.constant dense<0.000000e+00> : vector<16xf32>
    %154 = vector.multi_reduction <add>, %153, %cst_49 [1] : vector<16x16xf32> to vector<16xf32>
    %155 = vector.shape_cast %154 : vector<16xf32> to vector<16x1xf32>
    %156 = tpu.reciprocal %155 {approx = true} : vector<16x1xf32> -> vector<16x1xf32>
    %cst_50 = arith.constant 5.000000e-01 : f32
    %157 = vector.broadcast %cst_50 : f32 to vector<16x1xf32>
    %158 = arith.mulf %156, %157 : vector<16x1xf32>
    %159 = vector.broadcast %158 : vector<16x1xf32> to vector<16x16xf32>
    %160 = arith.mulf %153, %159 : vector<16x16xf32>
    %161 = arith.truncf %160 : vector<16x16xf32> to vector<16x16xbf16>
    %162 = vector.extract_strided_slice %105 {offsets = [0, 16], sizes = [16, 16], strides = [1, 1]} : vector<16x32xf32> to vector<16x16xf32>
    %163 = tpu.concatenate %151, %161 in 1 : vector<16x16xbf16>, vector<16x16xbf16> -> vector<16x32xbf16>
    %164 = tpu.concatenate %152, %162 in 0 : vector<16x16xf32>, vector<16x16xf32> -> vector<32x16xf32>
    %165 = arith.truncf %164 : vector<32x16xf32> to vector<32x16xbf16>
    %cst_51 = arith.constant dense<0.000000e+00> : vector<16x16xf32>
    %166 = tpu.matmul %163, %165, %cst_51 {dimension_numbers = #tpu.dot_dimension_numbers<[1], [0], [0], [1], [0, 0, 1, 1], [], []>} : vector<16x32xbf16>, vector<32x16xbf16>, vector<16x16xf32> -> vector<16x16xf32>
    %167 = vector.broadcast %100 : vector<1x16xf32> to vector<16x16xf32>
    %168 = arith.addf %166, %167 : vector<16x16xf32>
    %cst_52 = arith.constant dense<0.000000e+00> : vector<16xf32>
    %169 = vector.multi_reduction <add>, %168, %cst_52 [0] : vector<16x16xf32> to vector<16xf32>
    %170 = vector.shape_cast %169 : vector<16xf32> to vector<1x16xf32>
    %cst_53 = arith.constant 6.250000e-02 : f32
    %171 = vector.broadcast %cst_53 : f32 to vector<1x16xf32>
    %172 = arith.mulf %170, %171 : vector<1x16xf32>
    %173 = vector.broadcast %172 : vector<1x16xf32> to vector<16x16xf32>
    %174 = arith.subf %168, %173 : vector<16x16xf32>
    %175 = arith.mulf %174, %174 : vector<16x16xf32>
    %cst_54 = arith.constant dense<0.000000e+00> : vector<16xf32>
    %176 = vector.multi_reduction <add>, %175, %cst_54 [0] : vector<16x16xf32> to vector<16xf32>
    %177 = vector.shape_cast %176 : vector<16xf32> to vector<1x16xf32>
    %cst_55 = arith.constant 6.250000e-02 : f32
    %178 = vector.broadcast %cst_55 : f32 to vector<1x16xf32>
    %179 = arith.mulf %177, %178 : vector<1x16xf32>
    %cst_56 = arith.constant 9.99999974E-6 : f32
    %180 = vector.broadcast %cst_56 : f32 to vector<1x16xf32>
    %181 = arith.addf %179, %180 : vector<1x16xf32>
    %182 = math.rsqrt %181 : vector<1x16xf32>
    %183 = arith.mulf %101, %182 : vector<1x16xf32>
    %184 = vector.broadcast %183 : vector<1x16xf32> to vector<16x16xf32>
    %185 = arith.mulf %174, %184 : vector<16x16xf32>
    %186 = vector.broadcast %102 : vector<1x16xf32> to vector<16x16xf32>
    %187 = arith.addf %185, %186 : vector<16x16xf32>
    %cst_57 = arith.constant 0.000000e+00 : f32
    %188 = vector.broadcast %cst_57 : f32 to vector<16x16xf32>
    %189 = arith.maximumf %187, %188 : vector<16x16xf32>
    %c24 = arith.constant 24 : index
    %c0_58 = arith.constant 0 : index
    %190 = vector.load %arg5[%c24, %c0_58] : memref<56x36xbf16, #tpu.memory_space<vmem>>, vector<16x36xbf16>
    %c6 = arith.constant 6 : index
    %c0_59 = arith.constant 0 : index
    %191 = vector.load %arg6[%c6, %c0_59] : memref<10x16xf32, #tpu.memory_space<vmem>>, vector<1x16xf32>
    %c7 = arith.constant 7 : index
    %c0_60 = arith.constant 0 : index
    %192 = vector.load %arg6[%c7, %c0_60] : memref<10x16xf32, #tpu.memory_space<vmem>>, vector<1x16xf32>
    %c8_61 = arith.constant 8 : index
    %c0_62 = arith.constant 0 : index
    %193 = vector.load %arg6[%c8_61, %c0_62] : memref<10x16xf32, #tpu.memory_space<vmem>>, vector<1x16xf32>
    %194 = arith.truncf %189 : vector<16x16xf32> to vector<16x16xbf16>
    %cst_63 = arith.constant dense<0.000000e+00> : vector<16x36xf32>
    %195 = tpu.matmul %194, %190, %cst_63 {dimension_numbers = #tpu.dot_dimension_numbers<[1], [0], [0], [1], [0, 0, 1, 1], [], []>} : vector<16x16xbf16>, vector<16x36xbf16>, vector<16x36xf32> -> vector<16x36xf32>
    %196 = vector.extract_strided_slice %195 {offsets = [0, 0], sizes = [16, 32], strides = [1, 1]} : vector<16x36xf32> to vector<16x32xf32>
    %197 = vector.extract_strided_slice %195 {offsets = [0, 32], sizes = [16, 2], strides = [1, 1]} : vector<16x36xf32> to vector<16x2xf32>
    %198 = vector.extract_strided_slice %195 {offsets = [0, 34], sizes = [16, 2], strides = [1, 1]} : vector<16x36xf32> to vector<16x2xf32>
    %199 = tpu.transpose %198, [1, 0] : vector<16x2xf32> -> vector<2x16xf32>
    %c4_64 = arith.constant 4 : index
    %200 = memref.load %arg1[%c4_64] : memref<6xf32, #tpu.memory_space<smem>>
    %201 = vector.extract_strided_slice %197 {offsets = [0, 0], sizes = [16, 1], strides = [1, 1]} : vector<16x2xf32> to vector<16x1xf32>
    %202 = vector.extract_strided_slice %199 {offsets = [0, 0], sizes = [1, 16], strides = [1, 1]} : vector<2x16xf32> to vector<1x16xf32>
    %203 = vector.broadcast %201 : vector<16x1xf32> to vector<16x16xf32>
    %204 = vector.broadcast %202 : vector<1x16xf32> to vector<16x16xf32>
    %205 = arith.addf %203, %204 : vector<16x16xf32>
    %206 = vector.broadcast %200 : f32 to vector<16x16xf32>
    %207 = arith.mulf %7, %206 : vector<16x16xf32>
    %208 = arith.addf %205, %207 : vector<16x16xf32>
    %cst_65 = arith.constant 2.000000e-01 : f32
    %209 = vector.broadcast %cst_65 : f32 to vector<16x16xf32>
    %210 = arith.mulf %209, %208 : vector<16x16xf32>
    %211 = arith.maximumf %208, %210 : vector<16x16xf32>
    %cst_66 = arith.constant -1.000000e+30 : f32
    %212 = vector.broadcast %cst_66 : f32 to vector<16x16xf32>
    %213 = arith.select %5, %211, %212 : vector<16x16xi1>, vector<16x16xf32>
    %c5_67 = arith.constant 5 : index
    %214 = memref.load %arg1[%c5_67] : memref<6xf32, #tpu.memory_space<smem>>
    %215 = vector.extract_strided_slice %197 {offsets = [0, 1], sizes = [16, 1], strides = [1, 1]} : vector<16x2xf32> to vector<16x1xf32>
    %216 = vector.extract_strided_slice %199 {offsets = [1, 0], sizes = [1, 16], strides = [1, 1]} : vector<2x16xf32> to vector<1x16xf32>
    %217 = vector.broadcast %215 : vector<16x1xf32> to vector<16x16xf32>
    %218 = vector.broadcast %216 : vector<1x16xf32> to vector<16x16xf32>
    %219 = arith.addf %217, %218 : vector<16x16xf32>
    %220 = vector.broadcast %214 : f32 to vector<16x16xf32>
    %221 = arith.mulf %7, %220 : vector<16x16xf32>
    %222 = arith.addf %219, %221 : vector<16x16xf32>
    %cst_68 = arith.constant 2.000000e-01 : f32
    %223 = vector.broadcast %cst_68 : f32 to vector<16x16xf32>
    %224 = arith.mulf %223, %222 : vector<16x16xf32>
    %225 = arith.maximumf %222, %224 : vector<16x16xf32>
    %cst_69 = arith.constant -1.000000e+30 : f32
    %226 = vector.broadcast %cst_69 : f32 to vector<16x16xf32>
    %227 = arith.select %5, %225, %226 : vector<16x16xi1>, vector<16x16xf32>
    %228 = tpu.concatenate %213, %227 in 1 : vector<16x16xf32>, vector<16x16xf32> -> vector<16x32xf32>
    %cst_70 = arith.constant dense<0xFF800000> : vector<16xf32>
    %229 = vector.multi_reduction <maximumf>, %228, %cst_70 [1] : vector<16x32xf32> to vector<16xf32>
    %230 = vector.shape_cast %229 : vector<16xf32> to vector<16x1xf32>
    %231 = vector.broadcast %230 : vector<16x1xf32> to vector<16x32xf32>
    %232 = arith.subf %228, %231 : vector<16x32xf32>
    %233 = math.exp %232 : vector<16x32xf32>
    %234 = vector.extract_strided_slice %233 {offsets = [0, 0], sizes = [16, 16], strides = [1, 1]} : vector<16x32xf32> to vector<16x16xf32>
    %cst_71 = arith.constant dense<0.000000e+00> : vector<16xf32>
    %235 = vector.multi_reduction <add>, %234, %cst_71 [1] : vector<16x16xf32> to vector<16xf32>
    %236 = vector.shape_cast %235 : vector<16xf32> to vector<16x1xf32>
    %237 = tpu.reciprocal %236 {approx = true} : vector<16x1xf32> -> vector<16x1xf32>
    %cst_72 = arith.constant 5.000000e-01 : f32
    %238 = vector.broadcast %cst_72 : f32 to vector<16x1xf32>
    %239 = arith.mulf %237, %238 : vector<16x1xf32>
    %240 = vector.broadcast %239 : vector<16x1xf32> to vector<16x16xf32>
    %241 = arith.mulf %234, %240 : vector<16x16xf32>
    %242 = arith.truncf %241 : vector<16x16xf32> to vector<16x16xbf16>
    %243 = vector.extract_strided_slice %196 {offsets = [0, 0], sizes = [16, 16], strides = [1, 1]} : vector<16x32xf32> to vector<16x16xf32>
    %244 = vector.extract_strided_slice %233 {offsets = [0, 16], sizes = [16, 16], strides = [1, 1]} : vector<16x32xf32> to vector<16x16xf32>
    %cst_73 = arith.constant dense<0.000000e+00> : vector<16xf32>
    %245 = vector.multi_reduction <add>, %244, %cst_73 [1] : vector<16x16xf32> to vector<16xf32>
    %246 = vector.shape_cast %245 : vector<16xf32> to vector<16x1xf32>
    %247 = tpu.reciprocal %246 {approx = true} : vector<16x1xf32> -> vector<16x1xf32>
    %cst_74 = arith.constant 5.000000e-01 : f32
    %248 = vector.broadcast %cst_74 : f32 to vector<16x1xf32>
    %249 = arith.mulf %247, %248 : vector<16x1xf32>
    %250 = vector.broadcast %249 : vector<16x1xf32> to vector<16x16xf32>
    %251 = arith.mulf %244, %250 : vector<16x16xf32>
    %252 = arith.truncf %251 : vector<16x16xf32> to vector<16x16xbf16>
    %253 = vector.extract_strided_slice %196 {offsets = [0, 16], sizes = [16, 16], strides = [1, 1]} : vector<16x32xf32> to vector<16x16xf32>
    %254 = tpu.concatenate %242, %252 in 1 : vector<16x16xbf16>, vector<16x16xbf16> -> vector<16x32xbf16>
    %255 = tpu.concatenate %243, %253 in 0 : vector<16x16xf32>, vector<16x16xf32> -> vector<32x16xf32>
    %256 = arith.truncf %255 : vector<32x16xf32> to vector<32x16xbf16>
    %cst_75 = arith.constant dense<0.000000e+00> : vector<16x16xf32>
    %257 = tpu.matmul %254, %256, %cst_75 {dimension_numbers = #tpu.dot_dimension_numbers<[1], [0], [0], [1], [0, 0, 1, 1], [], []>} : vector<16x32xbf16>, vector<32x16xbf16>, vector<16x16xf32> -> vector<16x16xf32>
    %258 = vector.broadcast %191 : vector<1x16xf32> to vector<16x16xf32>
    %259 = arith.addf %257, %258 : vector<16x16xf32>
    %cst_76 = arith.constant dense<0.000000e+00> : vector<16xf32>
    %260 = vector.multi_reduction <add>, %259, %cst_76 [0] : vector<16x16xf32> to vector<16xf32>
    %261 = vector.shape_cast %260 : vector<16xf32> to vector<1x16xf32>
    %cst_77 = arith.constant 6.250000e-02 : f32
    %262 = vector.broadcast %cst_77 : f32 to vector<1x16xf32>
    %263 = arith.mulf %261, %262 : vector<1x16xf32>
    %264 = vector.broadcast %263 : vector<1x16xf32> to vector<16x16xf32>
    %265 = arith.subf %259, %264 : vector<16x16xf32>
    %266 = arith.mulf %265, %265 : vector<16x16xf32>
    %cst_78 = arith.constant dense<0.000000e+00> : vector<16xf32>
    %267 = vector.multi_reduction <add>, %266, %cst_78 [0] : vector<16x16xf32> to vector<16xf32>
    %268 = vector.shape_cast %267 : vector<16xf32> to vector<1x16xf32>
    %cst_79 = arith.constant 6.250000e-02 : f32
    %269 = vector.broadcast %cst_79 : f32 to vector<1x16xf32>
    %270 = arith.mulf %268, %269 : vector<1x16xf32>
    %cst_80 = arith.constant 9.99999974E-6 : f32
    %271 = vector.broadcast %cst_80 : f32 to vector<1x16xf32>
    %272 = arith.addf %270, %271 : vector<1x16xf32>
    %273 = math.rsqrt %272 : vector<1x16xf32>
    %274 = arith.mulf %192, %273 : vector<1x16xf32>
    %275 = vector.broadcast %274 : vector<1x16xf32> to vector<16x16xf32>
    %276 = arith.mulf %265, %275 : vector<16x16xf32>
    %277 = vector.broadcast %193 : vector<1x16xf32> to vector<16x16xf32>
    %278 = arith.addf %276, %277 : vector<16x16xf32>
    %cst_81 = arith.constant 0.000000e+00 : f32
    %279 = vector.broadcast %cst_81 : f32 to vector<16x16xf32>
    %280 = arith.maximumf %278, %279 : vector<16x16xf32>
    %c0_82 = arith.constant 0 : index
    %c0_83 = arith.constant 0 : index
    %281 = vector.load %arg4[%c0_82, %c0_83] : memref<2x16xbf16, #tpu.memory_space<vmem>>, vector<2x16xbf16>
    %282 = arith.truncf %280 : vector<16x16xf32> to vector<16x16xbf16>
    %cst_84 = arith.constant dense<0.000000e+00> : vector<2x16xf32>
    %283 = tpu.matmul %281, %282, %cst_84 {dimension_numbers = #tpu.dot_dimension_numbers<[1], [0], [0], [1], [0, 0, 1, 1], [], []>} : vector<2x16xbf16>, vector<16x16xbf16>, vector<2x16xf32> -> vector<2x16xf32>
    %c40 = arith.constant 40 : index
    %c0_85 = arith.constant 0 : index
    %284 = vector.load %arg5[%c40, %c0_85] : memref<56x36xbf16, #tpu.memory_space<vmem>>, vector<16x4xbf16>
    %c9 = arith.constant 9 : index
    %c0_86 = arith.constant 0 : index
    %285 = vector.load %arg6[%c9, %c0_86] : memref<10x16xf32, #tpu.memory_space<vmem>>, vector<1x4xf32>
    %286 = arith.truncf %283 : vector<2x16xf32> to vector<2x16xbf16>
    %cst_87 = arith.constant dense<0.000000e+00> : vector<2x4xf32>
    %287 = tpu.matmul %286, %284, %cst_87 {dimension_numbers = #tpu.dot_dimension_numbers<[1], [0], [0], [1], [0, 0, 1, 1], [], []>} : vector<2x16xbf16>, vector<16x4xbf16>, vector<2x4xf32> -> vector<2x4xf32>
    %288 = vector.broadcast %285 : vector<1x4xf32> to vector<2x4xf32>
    %289 = arith.addf %287, %288 : vector<2x4xf32>
    %cst_88 = arith.constant dense<0xFF800000> : vector<2xf32>
    %290 = vector.multi_reduction <maximumf>, %289, %cst_88 [1] : vector<2x4xf32> to vector<2xf32>
    %291 = vector.shape_cast %290 : vector<2xf32> to vector<2x1xf32>
    %292 = vector.broadcast %291 : vector<2x1xf32> to vector<2x4xf32>
    %293 = arith.subf %289, %292 : vector<2x4xf32>
    %294 = math.exp %293 : vector<2x4xf32>
    %cst_89 = arith.constant dense<0.000000e+00> : vector<2xf32>
    %295 = vector.multi_reduction <add>, %294, %cst_89 [1] : vector<2x4xf32> to vector<2xf32>
    %296 = vector.shape_cast %295 : vector<2xf32> to vector<2x1xf32>
    %297 = vector.broadcast %296 : vector<2x1xf32> to vector<2x4xf32>
    %298 = arith.divf %294, %297 : vector<2x4xf32>
    %c0_90 = arith.constant 0 : index
    %c0_91 = arith.constant 0 : index
    %c0_92 = arith.constant 0 : index
    %299 = vector.load %arg7[%c0_90, %c0_91, %c0_92] : memref<1x2x4xf32, #tpu.memory_space<vmem>>, vector<1x2x4xf32>
    %300 = vector.shape_cast %299 : vector<1x2x4xf32> to vector<2x4xf32>
    %301 = vector.shape_cast %298 : vector<2x4xf32> to vector<1x2x4xf32>
    tpu.vector_store %arg7[%c0_90, %c0_91, %c0_92], %301 {strides = array<i32>} : memref<1x2x4xf32, #tpu.memory_space<vmem>>, vector<1x2x4xf32>,
    return
  }
  func.func @transform_0(%arg0: i32, %arg1: memref<6xf32, #tpu.memory_space<smem>>) -> (i32, i32, i32) {
    %c0_i32 = arith.constant 0 : i32
    %c0_i32_0 = arith.constant 0 : i32
    %c0_i32_1 = arith.constant 0 : i32
    return %arg0, %c0_i32, %c0_i32_0 : i32, i32, i32
  }
  func.func @transform_1(%arg0: i32, %arg1: memref<6xf32, #tpu.memory_space<smem>>) -> (i32, i32, i32, i32) {
    %c0_i32 = arith.constant 0 : i32
    %c0_i32_0 = arith.constant 0 : i32
    %c0_i32_1 = arith.constant 0 : i32
    %c0_i32_2 = arith.constant 0 : i32
    return %arg0, %c0_i32, %c0_i32_0, %c0_i32_1 : i32, i32, i32, i32
  }
  func.func @transform_2(%arg0: i32, %arg1: memref<6xf32, #tpu.memory_space<smem>>) -> (i32, i32) {
    %c0_i32 = arith.constant 0 : i32
    %c0_i32_0 = arith.constant 0 : i32
    %c0_i32_1 = arith.constant 0 : i32
    return %c0_i32, %c0_i32_0 : i32, i32
  }
  func.func @transform_3(%arg0: i32, %arg1: memref<6xf32, #tpu.memory_space<smem>>) -> (i32, i32) {
    %c0_i32 = arith.constant 0 : i32
    %c0_i32_0 = arith.constant 0 : i32
    %c0_i32_1 = arith.constant 0 : i32
    return %c0_i32, %c0_i32_0 : i32, i32
  }
  func.func @transform_4(%arg0: i32, %arg1: memref<6xf32, #tpu.memory_space<smem>>) -> (i32, i32) {
    %c0_i32 = arith.constant 0 : i32
    %c0_i32_0 = arith.constant 0 : i32
    %c0_i32_1 = arith.constant 0 : i32
    return %c0_i32, %c0_i32_0 : i32, i32
  }
  func.func @transform_5(%arg0: i32, %arg1: memref<6xf32, #tpu.memory_space<smem>>) -> (i32, i32, i32) {
    %c0_i32 = arith.constant 0 : i32
    %c0_i32_0 = arith.constant 0 : i32
    %c0_i32_1 = arith.constant 0 : i32
    return %arg0, %c0_i32, %c0_i32_0 : i32, i32, i32
  }
}

</mosaic_0001>

<bundles_post_ra>
// kernel: tpu_custom_call.1
= control target key start
LH: loop header
LB: loop body
LE: loop exit
PB: predicated region body
PF: predicated region fallthrough
CT: control target
= control target key end

     0   :  { %s2083_s0 = inlined_call_operand.vmem [shape: f32[6], index: 0, kind: input, shape index: {}]   ;;  %s2084_s1 = inlined_call_operand.vmem [shape: f32[4,16,8], index: 1, kind: input, shape index: {}]   ;;  %s2085_s2 = inlined_call_operand.vmem [shape: f32[4,2,16,16], index: 2, kind: input, shape index: {}]   ;;  %s2086_s3 = inlined_call_operand.vmem [shape: bf16[2,16], index: 3, kind: input, shape index: {}]   ;;  %s2087_s4 = inlined_call_operand.vmem [shape: bf16[56,36], index: 4, kind: input, shape index: {}]   ;;  %s2088_s5 = inlined_call_operand.vmem [shape: f32[10,16], index: 5, kind: input, shape index: {}]   ;;  %s2089_s6 = inlined_call_operand.hbm [shape: f32[4,2,4], index: 6, kind: output, shape index: {}]  }
   0x1   :  { %s11_s23 = sshll.u32 %s2083_s0, 4  ;;  %s12_s23 = int_to_ptr.vmem [resolvable:$true] %s11_s23 }
   0x2   :  { %s1599_s24 = scalar_lea.vmem %s12_s23, 16  ;;  %p1604_p1 = scmp.lt.s32.totalorder %s12_s23, %s12_s23 }
   0x3   :  { %p1600_p0 = scmp.ne.s32.totalorder %s12_s23, %s1599_s24  ;;  %p1605_p2 = scmp.lt.s32.totalorder %s1599_s24, %s1599_s24 }
   0x5   :  { %p1606_p3 = por %p1605_p2, %p1604_p1 }
   0x7   :  { %p1607_p4 = pnand %p1606_p3, %p1600_p0 }
   0x9   :  { %1610 = shalt.err (!%p1607_p4)  }
   0xa   :  { %s1675_s25 = smov [#allocation3]  }
   0xb   :  { %14 = dma.vmem_to_smem %s12_s23, 16, %s1675_s25, [#allocation2] }
   0xc   :  { %1653 = dma.done.wait [#allocation2], 16 }
   0xd   :  { %1654 = vsyncadd [#allocation2], 4294967280 }
   0xe   :  { %16 = sfence }
   0xf   :  { %17 = vsyncpa [#allocation5], 0 }
  0x10   :  { %19 = vsyncpa [#allocation5 + $0x1], 0  ;;  %s1722_s26 = smov 0   ;;  %s1724_s27 = smov 0  }
  0x11   :  { %s1726_s0 = smov 0   ;;  %s1728_s28 = smov 0  }
  0x12 LB: > { %s1743_s29 = sadd.s32 4294967295, %s1673_s28   ;;  %s1369_s30 = sadd.s32 4294967294, %s1673_s28   ;;  %s1673_s28 = sphi %s1728_s28, %s2095_s28   ;;  %s1669_s0 = sphi %s1726_s0, %s2094_s0   ;;  %s1665_s27 = sphi %s1724_s27, %s2093_s27   ;;  %s1661_s26 = sphi %s1722_s26, %s2092_s26  }
  0x13   : > { %s1747_s7 = sadd.s32 1, %s1673_s28   ;;  %s147_s8 = sadd.s32 1, %s1669_s0 }
  0x14   : > { %s144_s9 = ssub.s32 %s1673_s28, %s1747_s7  ;;  %p157_p5 = scmp.ne.s32.totalorder %s1669_s0, %s1665_s27 }
  0x15   : > { %p145_p6 = scmp.eq.s32.totalorder %s144_s9, 0  ;;  %p158_p7 = scmp.eq.s32.totalorder %s1743_s29, 3 }
  0x16   : > { %p163_p8 = scmp.ne.s32.totalorder %s1665_s27, %s1661_s26  ;;  %p164_p9 = scmp.eq.s32.totalorder %s1369_s30, 3 }
  0x17   : > { %s1758_s10 = scalar_select %p145_p6, %s1669_s0, %s147_s8  }
  0x18   : > { %p1760_p10 = por %p158_p7, %p157_p5  ;;  %p1764_p11 = por %p164_p9, %p163_p8 }
  0x19   : > { %p1372_p12 = scmp.ge.s32.totalorder %s1673_s28, 1  ;;  %p207_p13 = scmp.lt.s32.totalorder %s1673_s28, 5 }
  0x1b   : > { %p208_p0 = pnand %p1372_p12, %p207_p13 }
  0x1c   : > { %p240_p1 = scmp.lt.s32.totalorder (!%p208_p0), %s1743_s29, 3  ;;  %s1679_s20 = smov (!%p208_p0), 94  }
  0x1d   : > { %211 = sbr.rel (%p208_p0) target bundleno = 4542 (0x11be), region = 40  ;;  %s1381_s21 = sld [smem:[#allocation3 + $0x1]] (!%p208_p0) }
  0x1e   : > { %s1681_s30 = smov (!%p208_p0), 16   ;;  %s354_s8 = sld [smem:[#allocation3]] (!%p208_p0) }
  0x1f   : > { %s1682_s9 = smov (!%p208_p0), 112   ;;  %s1387_s23 = sld [smem:[#allocation3 + $0x2]] (!%p208_p0) }
  0x20   : > { %s1394_s18 = sld [smem:[#allocation3 + $0x4]] (!%p208_p0)  ;;  %s1683_s24 = smov (!%p208_p0), [#allocation4]  }
  0x22   : > { %v260_v0 = vld [vmem:[%s2087_s4] sm:$0xf]  ;;  %vm269_vm0 = vcmask 1043456   ;;  %v1676_v1 = vmov 0.0   ;;  %vm1677_vm1 = vmmov 0   ;;  %s1778_s15 = scalar_select %p240_p1, %s1743_s29, 3  ;;  %v363_v16 = vlaneseq }
  0x23   : > { %1428 = vmatprep.subr.bf16.mxu0 %v1676_v1  ;;  %v271_v2 = vsel %vm269_vm0, %v260_v0, 0  ;;  %1430 = vmatprep.mubr.msk.bf16.mxu0 %vm1677_vm1, %v1676_v1  ;;  %v1678_v3 = vmov 33   ;;  %vm265_vm2 = vcmask 64512   ;;  %v1680_v13 = vmov 32  }
  0x24   : > { %1429 = vmatpush3.bf16.msra.mxu0 %v271_v2  ;;  %1529 = vset.pattern.permute.xlu1 %v1678_v3  ;;  %s1407_s16 = sshll.u32 %s1778_s15, 4  ;;  %s1408_s22 = sshll.u32 %s1778_s15, 5  ;;  %v364_v17 = vshrl.u32 %v363_v16, 7  ;;  %v395_v22 = vstv %s1381_s21  ;;  %v369_v43 = vstv %s354_s8  ;;  %vm414_vm5 = vcmask 130048  }
  0x25   : > { %1434 = vmatprep.subr.bf16.mxu1 %v1676_v1  ;;  %1438 = vmatprep.mubr.msk.bf16.mxu1 %vm1677_vm1, %v1676_v1  ;;  %s244_s19 = scalar_lea.vmem %s2084_s1, %s1407_s16  ;;  %s249_s25 = scalar_lea.vmem %s2085_s2, %s1408_s22  ;;  %vm417_vm6 = vcmask 261120   ;;  %vm1271_vm7 = vcmask 25600  }
  0x26   : > { %1442 = vmatprep.subr.bf16.mxu0 %v1676_v1  ;;  %v251_v4 = vld [vmem:[%s244_s19] sm:$0xff]  ;;  %v252_v5 = vld [vmem:[%s244_s19 + $0x8] sm:$0xff]  ;;  %v1813_v19 = vsub.s32 1, %v364_v17  ;;  %v1815_v20 = vld [vmem:[%s249_s25 + $0x10] sm:$0xff]  ;;  %v1834_v40 = vsub.s32 0, %v364_v17  ;;  %s1388_s22 = sld [smem:[#allocation3 + $0x3]] }
  0x27   : > { %v264_v6 = vpack.c.bf16 %v252_v5, %v251_v4  ;;  %v1817_v21 = vld [vmem:[%s249_s25 + $0x18] sm:$0xff]  ;;  %v396_v25 = vmul.f32 %v1815_v20, %v395_v22  ;;  %v1822_v30 = vld [vmem:[%s249_s25] sm:$0xff]  ;;  %v1825_v36 = vld [vmem:[%s249_s25 + $0x8] sm:$0xff]  ;;  %v370_v44 = vmul.f32 %v1815_v20, %v369_v43  ;;  %s237_s16 = sand.u32 1, %s1665_s27   ;;  %s1615_s25 = sshll.u32 %s1683_s24, 4  ;;  %s1616_s25 = int_to_ptr.vmem [resolvable:$false] %s1615_s25 }
  0x28   : > { %v397_v26 = vmul.f32 %v1817_v21, %v395_v22  ;;  %vm255_vm3 = vcmp.gt.f32.partialorder %v1822_v30, 0.0  ;;  %vm256_vm4 = vcmp.gt.f32.partialorder %v1825_v36, 0.0  ;;  %v371_v47 = vmul.f32 %v1817_v21, %v369_v43  ;;  %s1373_s17 = sshll.u32 %s237_s16, 1 }
  0x29   : > { %1431 = vmatmul.mubr.msk.bf16.vlgmr.msra.gmra.mxu0 %vm265_vm2, %v264_v6 }
  0x2a   : > { %1444 = vmatprep.mubr.msk.bf16.mxu0 %vm1677_vm1, %v1676_v1 }
  0xe9   : > { %v1791_v7 = vpop.f32.mrf.mxu0 }
  0xea   : > { %382 = vperm.xlu1 %1529, %v1791_v7   ;;  %316 = vrot.lane.b32.xlu0 %v1791_v7, %s1679_s20 }
  0xeb   : > { %v1432_v8 = vpop.f32.mrf.mxu0 }
  0xed   : > { %v1796_v9 = vpop.f32.mrf.mxu0 }
  0xee   : > { %386 = vperm.xlu1 %1529, %v1796_v9   ;;  %318 = vrot.lane.b32.xlu0 %v1796_v9, %s1679_s20  ;;  %v1531_v10 = vpack.i.bf16 %v1796_v9, %v1791_v7  ;;  %v473_v11 = vpack.c.bf16 %v1796_v9, %v1791_v7 }
  0xef   : > { %v1433_v12 = vpop.f32.mrf.mxu0 }
  0xf2   : > { %1530 = vset.pattern.permute.xlu1 %v1680_v13 }
  0xf3   : > { %356 = vperm.xlu1 %1530, %v1791_v7   ;;  %v1550_v7 = vld [vmem:[%s2087_s4 + $0x4] sm:$0xff]  }
  0xf4   : > { %1443 = vmatpush3.bf16.msra.mxu0 %v1550_v7 }
  0xf5   : > { %1456 = vmatprep.subr.bf16.mxu0 %v1676_v1 }
  0xf7   : > { %360 = vperm.xlu1 %1530, %v1796_v9   ;;  %v1382_v9 = vld [vmem:[%s2088_s5] ss:$0 sm:$0xff] }
 0x15c   : > { %v317_v14 = vpop.permute.xlu0 %316 }
 0x15d   : > { %322 = vxpose.xlu0.b32.start [1/2] (short) (narrow) %v317_v14, 8 }
 0x160   : > { %v319_v15 = vpop.permute.xlu0 %318 }
 0x161   : > { %323 = vxpose.xlu0.b32.end [2/2] (short) (narrow) %v319_v15, 8 }
 0x165   : > { %v383_v18 = vpop.permute.xlu1 %382 }
 0x169   : > { %v387_v27 = vpop.permute.xlu1 %386 }
 0x16e   : > { %v357_v42 = vpop.permute.xlu1 %356 }
 0x172   : > { %v361_v46 = vpop.permute.xlu1 %360 }
 0x18a   : > { %1536 = vset.pattern.permute.xlu0 %v1678_v3 }
 0x1d9   : > { %v338_v23 = vpop.trf.xlu0 }
 0x1da   : > { %v392_v24 = vrot.slane %v338_v23, %v1813_v19  ;;  %v366_v41 = vrot.slane %v338_v23, %v1834_v40 }
 0x1dc   : > { %v393_v28 = vadd.f32 %v392_v24, %v383_v18  ;;  %v394_v29 = vadd.f32 %v392_v24, %v387_v27  ;;  %v367_v45 = vadd.f32 %v366_v41, %v357_v42  ;;  %v368_v48 = vadd.f32 %v366_v41, %v361_v46 }
 0x1de   : > { %v398_v31 = vadd.f32 %v396_v25, %v393_v28  ;;  %v399_v32 = vadd.f32 %v397_v26, %v394_v29  ;;  %v372_v49 = vadd.f32 %v370_v44, %v367_v45  ;;  %v373_v50 = vadd.f32 %v371_v47, %v368_v48 }
 0x1e0   : > { %v400_v33 = vmul.f32 0.2, %v398_v31  ;;  %v401_v34 = vmul.f32 0.2, %v399_v32  ;;  %v374_v51 = vmul.f32 0.2, %v372_v49 }
 0x1e1   : > { %v375_v53 = vmul.f32 0.2, %v373_v50 }
 0x1e2   : > { %v402_v35 = vmax.f32 %v398_v31, %v400_v33  ;;  %v403_v38 = vmax.f32 %v399_v32, %v401_v34  ;;  %v376_v52 = vmax.f32 %v372_v49, %v374_v51 }
 0x1e3   : > { %v377_v56 = vmax.f32 %v373_v50, %v375_v53 }
 0x1e4   : > { %v404_v37 = vsel %vm255_vm3, %v402_v35, -1e+30  ;;  %v405_v39 = vsel %vm256_vm4, %v403_v38, -1e+30  ;;  %v378_v55 = vsel %vm255_vm3, %v376_v52, -1e+30 }
 0x1e5   : > { %408 = vrot.lane.b32.xlu1 %v404_v37, %s1681_s30  ;;  %v379_v60 = vsel %vm256_vm4, %v377_v56, -1e+30 }
 0x1e9   : > { %410 = vrot.lane.b32.xlu1 %v405_v39, %s1681_s30 }
 0x257   : > { %v409_v54 = vpop.permute.xlu1 %408 }
 0x258   : > { %v415_v57 = vsel %vm414_vm5, %v378_v55, %v409_v54 }
 0x259   : > { %v418_v58 = vsel %vm417_vm6, %v415_v57, -inf }
 0x25a   : > { %419 = vmax.xlane.f32.xlu1 %v418_v58 }
 0x25b   : > { %v411_v59 = vpop.permute.xlu1 %410 }
 0x25c   : > { %v416_v61 = vsel %vm414_vm5, %v379_v60, %v411_v59 }
 0x25d   : > { %v421_v62 = vsel %vm417_vm6, %v416_v61, -inf }
 0x25e   : > { %422 = vmax.xlane.f32.xlu0 %v421_v62 }
 0x2e3   : > { %v420_v63 = vpop.xlane.xlu1 %419 }
 0x2e4   : > { %v424_v0 = vsub.f32 %v415_v57, %v420_v63 }
 0x2e6   : > { %v426_v2 = vmul.f32 1.442695, %v424_v0 }
 0x2e7   : > { %v423_v4 = vpop.xlane.xlu0 %422 }
 0x2e8   : > { %1553 = vpow2.f32 %v426_v2  ;;  %v425_v5 = vsub.f32 %v416_v61, %v423_v4 }
 0x2ea   : > { %v428_v6 = vmul.f32 1.442695, %v425_v5 }
 0x2ec   : > { %1555 = vpow2.f32 %v428_v6 }
 0x2f5   : > { %v1554_v8 = vpop.eup %1553 }
 0x2f6   : > { %445 = vrot.lane.b32.xlu1 %v1554_v8, %s1682_s9  ;;  %v430_v15 = vsel %vm414_vm5, %v1554_v8, 0.0 }
 0x2f9   : > { %v1556_v12 = vpop.eup %1555 }
 0x2fa   : > { %447 = vrot.lane.b32.xlu1 %v1556_v12, %s1682_s9  ;;  %v433_v14 = vsel %vm414_vm5, %v1556_v12, 0.0 }
 0x2fb   : > { %434 = vadd.xlane.f32.xlu0 %v433_v14 }
 0x31e   : > { %431 = vadd.xlane.f32.xlu1 %v430_v15 }
 0x368   : > { %v446_v16 = vpop.permute.xlu1 %445 }
 0x369   : > { %v451_v17 = vsel %vm414_vm5, %v446_v16, 0.0 }
 0x36a   : > { %452 = vadd.xlane.f32.xlu0 %v451_v17 }
 0x36c   : > { %v448_v18 = vpop.permute.xlu1 %447 }
 0x36d   : > { %v454_v22 = vsel %vm414_vm5, %v448_v18, 0.0 }
 0x36e   : > { %455 = vadd.xlane.f32.xlu0 %v454_v22 }
 0x384   : > { %1532 = vrot.lane.b32.xlu0 %v1531_v10, %s1682_s9  ;;  %v435_v23 = vpop.xlane.xlu0 %434 }
 0x3a7   : > { %v432_v24 = vpop.xlane.xlu1 %431 }
 0x3a8   : > { %1557 = vrcp.f32 %v432_v24  ;;  %v262_v24 = vld [vmem:[%s2088_s5 + $0x1] sm:$0x1] }
 0x3a9   : > { %1559 = vrcp.f32 %v435_v23 }
 0x3b5   : > { %v1558_v32 = vpop.eup %1557 }
 0x3b6   : > { %v1560_v33 = vpop.eup %1559  ;;  %v438_v35 = vmul.f32 0.5, %v1558_v32 }
 0x3b7   : > { %v439_v10 = vmul.f32 0.5, %v1560_v33 }
 0x3b8   : > { %v440_v39 = vmul.f32 %v1554_v8, %v438_v35 }
 0x3b9   : > { %v441_v42 = vmul.f32 %v1556_v12, %v439_v10 }
 0x3bb   : > { %v442_v45 = vpack.c.bf16 %v441_v42, %v440_v39 }
 0x3f3   : > { %v453_v25 = vpop.xlane.xlu0 %452 }
 0x3f4   : > { %1561 = vrcp.f32 %v453_v25 }
 0x3f7   : > { %v456_v26 = vpop.xlane.xlu0 %455 }
 0x3f8   : > { %1563 = vrcp.f32 %v456_v26 }
 0x3fb   : > { %v1533_v27 = vpop.permute.xlu0 %1532 }
 0x3fc   : > { %v1535_v28 = vunpack.i.h.bf16 %v1533_v27  ;;  %v1534_v29 = vunpack.i.l.bf16 %v1533_v27 }
 0x3fe   : > { %v474_v31 = vpack.c.bf16 %v1535_v28, %v1534_v29  ;;  %v1384_v28 = vld [vmem:[%s2088_s5 + $0x2] ss:$0 sm:$0xff] }
 0x400   : > { %1435 = vmatpush3.bf16.msra.mxu1 %v474_v31 }
 0x401   : > { %v1562_v34 = vpop.eup %1561  ;;  %1436 = vmatprep.subr.bf16.mxu1 %v1676_v1 }
 0x402   : > { %v459_v37 = vmul.f32 0.5, %v1562_v34 }
 0x404   : > { %1437 = vmatpush3.bf16.msra.mxu1 %v473_v11  ;;  %v461_v43 = vmul.f32 %v1554_v8, %v459_v37 }
 0x405   : > { %v1564_v38 = vpop.eup %1563  ;;  %1448 = vmatprep.subr.bf16.mxu1 %v1676_v1 }
 0x406   : > { %v460_v41 = vmul.f32 0.5, %v1564_v38 }
 0x408   : > { %v462_v44 = vmul.f32 %v1556_v12, %v460_v41 }
 0x40a   : > { %v463_v46 = vpack.c.bf16 %v462_v44, %v461_v43 }
 0x40c   : > { %v466_v47 = vsel %vm414_vm5, %v442_v45, %v463_v46 }
 0x40d   : > { %1439 = vmatmul.mubr.msk.bf16.vlgmr.msra.gmra.mxu1 %vm417_vm6, %v466_v47  ;;  %v700_v47 = vstv %s1388_s22  ;;  %s1285_s22 = scalar_lea.sflag [#allocation5], %s237_s16 }
 0x40e   : > { %1452 = vmatprep.mubr.msk.bf16.mxu1 %vm1677_vm1, %v1676_v1 }
 0x4cd   : > { %v515_v11 = vpop.f32.mrf.mxu1 }
 0x4ce   : > { %v516_v49 = vadd.f32 %v1382_v9, %v515_v11  ;;  %v701_v11 = vmul.f32 %v1815_v20, %v700_v47 }
 0x4cf   : > { %v1440_v48 = vpop.f32.mrf.mxu1 }
 0x4d0   : > { %v522_v53 = vsel %vm414_vm5, %v516_v49, 0.0 }
 0x4d1   : > { %v518_v50 = vpop.f32.mrf.mxu1 }
 0x4d2   : > { %v519_v51 = vadd.f32 %v1382_v9, %v518_v50 }
 0x4d3   : > { %v1441_v52 = vpop.f32.mrf.mxu1 }
 0x4d4   : > { %v523_v54 = vsel %vm414_vm5, %v519_v51, 0.0 }
 0x4d5   : > { %v524_v55 = vadd.f32 %v523_v54, %v522_v53 }
 0x4d7   : > { %v525_v56 = vrot.slane %v524_v55, 4 }
 0x4d9   : > { %v526_v57 = vadd.f32 %v525_v56, %v524_v55 }
 0x4db   : > { %v527_v58 = vrot.slane %v526_v57, 2 }
 0x4dd   : > { %v528_v59 = vadd.f32 %v527_v58, %v526_v57 }
 0x4df   : > { %v529_v60 = vrot.slane %v528_v59, 1 }
 0x4e1   : > { %v530_v61 = vadd.f32 %v529_v60, %v528_v59 }
 0x4e3   : > { %v531_v62 = vmul.f32 0.0625, %v530_v61  ;;  %v674_v61 = vstv %s1387_s23 }
 0x4e5   : > { %v532_v63 = vsub.f32 %v516_v49, %v531_v62  ;;  %v533_v0 = vsub.f32 %v519_v51, %v531_v62  ;;  %v675_v62 = vmul.f32 %v1815_v20, %v674_v61 }
 0x4e7   : > { %v534_v2 = vmul.f32 %v532_v63, %v532_v63  ;;  %v535_v4 = vmul.f32 %v533_v0, %v533_v0 }
 0x4e9   : > { %v536_v5 = vsel %vm414_vm5, %v534_v2, 0.0  ;;  %v537_v6 = vsel %vm414_vm5, %v535_v4, 0.0  ;;  %v676_v2 = vmul.f32 %v1817_v21, %v674_v61 }
 0x4ea   : > { %v538_v8 = vadd.f32 %v537_v6, %v536_v5 }
 0x4ec   : > { %v539_v12 = vrot.slane %v538_v8, 4 }
 0x4ee   : > { %v540_v14 = vadd.f32 %v539_v12, %v538_v8 }
 0x4f0   : > { %v541_v15 = vrot.slane %v540_v14, 2 }
 0x4f2   : > { %v542_v16 = vadd.f32 %v541_v15, %v540_v14 }
 0x4f4   : > { %v543_v17 = vrot.slane %v542_v16, 1 }
 0x4f6   : > { %v544_v18 = vadd.f32 %v543_v17, %v542_v16 }
 0x4f8   : > { %v545_v22 = vmul.f32 0.0625, %v544_v18 }
 0x4fa   : > { %v546_v23 = vadd.f32 1e-05, %v545_v22 }
 0x4fc   : > { %1565 = vrsqrt.f32 %v546_v23 }
 0x509   : > { %v1566_v25 = vpop.eup %1565 }
 0x50a   : > { %v548_v26 = vmul.f32 %v1566_v25, %v262_v24 }
 0x50c   : > { %v552_v27 = vrot.slane %v548_v26, %v1834_v40 }
 0x50e   : > { %v553_v29 = vmul.f32 %v552_v27, %v532_v63  ;;  %v554_v31 = vmul.f32 %v552_v27, %v533_v0 }
 0x510   : > { %v559_v32 = vadd.f32 %v1384_v28, %v553_v29  ;;  %v560_v33 = vadd.f32 %v1384_v28, %v554_v31 }
 0x512   : > { %v561_v34 = vmax.f32 %v559_v32, 0.0  ;;  %v562_v35 = vmax.f32 %v560_v33, 0.0 }
 0x514   : > { %v568_v10 = vpack.c.bf16 %v562_v35, %v561_v34 }
 0x516   : > { %1445 = vmatmul.mubr.msk.bf16.vlgmr.msra.gmra.mxu0 %vm414_vm5, %v568_v10 }
 0x517   : > { %1458 = vmatprep.mubr.msk.bf16.mxu0 %vm1677_vm1, %v1676_v1 }
 0x5d6   : > { %v1887_v37 = vpop.f32.mrf.mxu0 }
 0x5d7   : > { %621 = vrot.lane.b32.xlu1 %v1887_v37, %s1679_s20 }
 0x5d8   : > { %v1446_v38 = vpop.f32.mrf.mxu0 }
 0x5da   : > { %v1891_v39 = vpop.f32.mrf.mxu0 }
 0x5db   : > { %623 = vrot.lane.b32.xlu0 %v1891_v39, %s1679_s20  ;;  %v1538_v41 = vpack.i.bf16 %v1891_v39, %v1887_v37  ;;  %v776_v42 = vpack.c.bf16 %v1891_v39, %v1887_v37 }
 0x5dc   : > { %v1447_v43 = vpop.f32.mrf.mxu0 }
 0x5df   : > { %687 = vperm.xlu0 %1536, %v1887_v37  }
 0x5e3   : > { %691 = vperm.xlu0 %1536, %v1891_v39  }
 0x5e7   : > { %1537 = vset.pattern.permute.xlu0 %v1680_v13  ;;  %v702_v13 = vmul.f32 %v1817_v21, %v700_v47 }
 0x5e8   : > { %661 = vperm.xlu0 %1537, %v1887_v37   ;;  %v1551_v37 = vld [vmem:[%s2087_s4 + $0xc] sm:$0xff]  }
 0x5e9   : > { %1457 = vmatpush3.bf16.msra.mxu0 %v1551_v37 }
 0x5ea   : > { %1470 = vmatprep.subr.bf16.mxu0 %v1676_v1 }
 0x5ec   : > { %665 = vperm.xlu0 %1537, %v1891_v39   ;;  %v1389_v39 = vld [vmem:[%s2088_s5 + $0x3] ss:$0 sm:$0xff] }
 0x649   : > { %v622_v44 = vpop.permute.xlu1 %621 }
 0x64a   : > { %627 = vxpose.xlu1.b32.start [1/2] (short) (narrow) %v622_v44, 8 }
 0x64d   : > { %v624_v45 = vpop.permute.xlu0 %623 }
 0x64e   : > { %628 = vxpose.xlu1.b32.end [2/2] (short) (narrow) %v624_v45, 8 }
 0x65a   : > { %v688_v46 = vpop.permute.xlu0 %687 }
 0x65e   : > { %v692_v48 = vpop.permute.xlu0 %691 }
 0x663   : > { %v662_v60 = vpop.permute.xlu0 %661 }
 0x667   : > { %v666_v0 = vpop.permute.xlu0 %665 }
 0x66c   : > { %1543 = vset.pattern.permute.xlu1 %v1678_v3 }
 0x6c6   : > { %v643_v7 = vpop.trf.xlu1 }
 0x6c7   : > { %v697_v9 = vrot.slane %v643_v7, %v1813_v19  ;;  %v671_v59 = vrot.slane %v643_v7, %v1834_v40 }
 0x6c9   : > { %v698_v49 = vadd.f32 %v697_v9, %v688_v46  ;;  %v699_v50 = vadd.f32 %v697_v9, %v692_v48  ;;  %v672_v63 = vadd.f32 %v671_v59, %v662_v60  ;;  %v673_v4 = vadd.f32 %v671_v59, %v666_v0 }
 0x6cb   : > { %v703_v51 = vadd.f32 %v701_v11, %v698_v49  ;;  %v704_v52 = vadd.f32 %v702_v13, %v699_v50  ;;  %v677_v5 = vadd.f32 %v675_v62, %v672_v63  ;;  %v678_v6 = vadd.f32 %v676_v2, %v673_v4 }
 0x6cd   : > { %v705_v53 = vmul.f32 0.2, %v703_v51  ;;  %v706_v54 = vmul.f32 0.2, %v704_v52  ;;  %v679_v8 = vmul.f32 0.2, %v677_v5 }
 0x6ce   : > { %v680_v14 = vmul.f32 0.2, %v678_v6 }
 0x6cf   : > { %v707_v55 = vmax.f32 %v703_v51, %v705_v53  ;;  %v708_v57 = vmax.f32 %v704_v52, %v706_v54  ;;  %v681_v12 = vmax.f32 %v677_v5, %v679_v8 }
 0x6d0   : > { %v682_v17 = vmax.f32 %v678_v6, %v680_v14 }
 0x6d1   : > { %v709_v56 = vsel %vm255_vm3, %v707_v55, -1e+30  ;;  %v710_v58 = vsel %vm256_vm4, %v708_v57, -1e+30  ;;  %v683_v16 = vsel %vm255_vm3, %v681_v12, -1e+30 }
 0x6d2   : > { %713 = vrot.lane.b32.xlu0 %v709_v56, %s1681_s30  ;;  %v684_v24 = vsel %vm256_vm4, %v682_v17, -1e+30 }
 0x6d6   : > { %715 = vrot.lane.b32.xlu0 %v710_v58, %s1681_s30 }
 0x744   : > { %v714_v15 = vpop.permute.xlu0 %713 }
 0x745   : > { %v719_v18 = vsel %vm414_vm5, %v683_v16, %v714_v15 }
 0x746   : > { %v721_v22 = vsel %vm417_vm6, %v719_v18, -inf }
 0x747   : > { %722 = vmax.xlane.f32.xlu0 %v721_v22 }
 0x748   : > { %v716_v23 = vpop.permute.xlu0 %715 }
 0x749   : > { %v720_v25 = vsel %vm414_vm5, %v684_v24, %v716_v23 }
 0x74a   : > { %v724_v26 = vsel %vm417_vm6, %v720_v25, -inf }
 0x74b   : > { %725 = vmax.xlane.f32.xlu1 %v724_v26 }
 0x7d0   : > { %v723_v27 = vpop.xlane.xlu0 %722 }
 0x7d1   : > { %v727_v28 = vsub.f32 %v719_v18, %v723_v27 }
 0x7d3   : > { %v729_v29 = vmul.f32 1.442695, %v727_v28 }
 0x7d4   : > { %v726_v31 = vpop.xlane.xlu1 %725 }
 0x7d5   : > { %1567 = vpow2.f32 %v729_v29  ;;  %v728_v32 = vsub.f32 %v720_v25, %v726_v31 }
 0x7d7   : > { %v731_v33 = vmul.f32 1.442695, %v728_v32 }
 0x7d9   : > { %1569 = vpow2.f32 %v731_v33 }
 0x7e2   : > { %v1568_v34 = vpop.eup %1567 }
 0x7e3   : > { %748 = vrot.lane.b32.xlu0 %v1568_v34, %s1682_s9  ;;  %v733_v38 = vsel %vm414_vm5, %v1568_v34, 0.0 }
 0x7e6   : > { %v1570_v35 = vpop.eup %1569 }
 0x7e7   : > { %750 = vrot.lane.b32.xlu0 %v1570_v35, %s1682_s9  ;;  %v736_v10 = vsel %vm414_vm5, %v1570_v35, 0.0 }
 0x7e8   : > { %737 = vadd.xlane.f32.xlu1 %v736_v10 }
 0x806   : > { %734 = vadd.xlane.f32.xlu0 %v733_v38 }
 0x855   : > { %v749_v43 = vpop.permute.xlu0 %748 }
 0x856   : > { %v754_v44 = vsel %vm414_vm5, %v749_v43, 0.0 }
 0x857   : > { %755 = vadd.xlane.f32.xlu1 %v754_v44 }
 0x859   : > { %v751_v45 = vpop.permute.xlu0 %750 }
 0x85a   : > { %v757_v46 = vsel %vm414_vm5, %v751_v45, 0.0 }
 0x85b   : > { %758 = vadd.xlane.f32.xlu1 %v757_v46 }
 0x86c   : > { %1539 = vrot.lane.b32.xlu1 %v1538_v41, %s1682_s9 }
 0x871   : > { %v738_v47 = vpop.xlane.xlu1 %737 }
 0x88f   : > { %v735_v7 = vpop.xlane.xlu0 %734 }
 0x890   : > { %1571 = vrcp.f32 %v735_v7 }
 0x891   : > { %1573 = vrcp.f32 %v738_v47  ;;  %v566_v47 = vld [vmem:[%s2088_s5 + $0x4] sm:$0x1] }
 0x89d   : > { %v1572_v51 = vpop.eup %1571 }
 0x89e   : > { %v1574_v52 = vpop.eup %1573  ;;  %v741_v54 = vmul.f32 0.5, %v1572_v51 }
 0x89f   : > { %v742_v41 = vmul.f32 0.5, %v1574_v52 }
 0x8a0   : > { %v743_v57 = vmul.f32 %v1568_v34, %v741_v54 }
 0x8a1   : > { %v744_v59 = vmul.f32 %v1570_v35, %v742_v41 }
 0x8a3   : > { %v745_v62 = vpack.c.bf16 %v744_v59, %v743_v57 }
 0x8e0   : > { %v756_v9 = vpop.xlane.xlu1 %755 }
 0x8e1   : > { %1575 = vrcp.f32 %v756_v9 }
 0x8e4   : > { %v759_v11 = vpop.xlane.xlu1 %758 }
 0x8e5   : > { %1577 = vrcp.f32 %v759_v11 }
 0x8e8   : > { %v1540_v13 = vpop.permute.xlu1 %1539 }
 0x8e9   : > { %v1542_v48 = vunpack.i.h.bf16 %v1540_v13  ;;  %v1541_v49 = vunpack.i.l.bf16 %v1540_v13  ;;  %v1391_v13 = vld [vmem:[%s2088_s5 + $0x5] ss:$0 sm:$0xff] }
 0x8eb   : > { %v777_v50 = vpack.c.bf16 %v1542_v48, %v1541_v49 }
 0x8ed   : > { %1449 = vmatpush3.bf16.msra.mxu1 %v777_v50 }
 0x8ee   : > { %v1576_v53 = vpop.eup %1575  ;;  %1450 = vmatprep.subr.bf16.mxu1 %v1676_v1 }
 0x8ef   : > { %v762_v55 = vmul.f32 0.5, %v1576_v53 }
 0x8f1   : > { %1451 = vmatpush3.bf16.msra.mxu1 %v776_v42  ;;  %v764_v60 = vmul.f32 %v1568_v34, %v762_v55 }
 0x8f2   : > { %v1578_v56 = vpop.eup %1577  ;;  %1462 = vmatprep.subr.bf16.mxu1 %v1676_v1 }
 0x8f3   : > { %v763_v58 = vmul.f32 0.5, %v1578_v56 }
 0x8f5   : > { %v765_v61 = vmul.f32 %v1570_v35, %v763_v58 }
 0x8f7   : > { %v766_v63 = vpack.c.bf16 %v765_v61, %v764_v60 }
 0x8f9   : > { %v769_v0 = vsel %vm414_vm5, %v745_v62, %v766_v63 }
 0x8fa   : > { %1453 = vmatmul.mubr.msk.bf16.vlgmr.msra.gmra.mxu1 %vm417_vm6, %v769_v0 }
 0x8fb   : > { %1466 = vmatprep.mubr.msk.bf16.mxu1 %vm1677_vm1, %v1676_v1 }
 0x9ba   : > { %v818_v42 = vpop.f32.mrf.mxu1 }
 0x9bb   : > { %v819_v4 = vadd.f32 %v1389_v39, %v818_v42 }
 0x9bc   : > { %v1454_v2 = vpop.f32.mrf.mxu1 }
 0x9bd   : > { %v825_v12 = vsel %vm414_vm5, %v819_v4, 0.0 }
 0x9be   : > { %v821_v5 = vpop.f32.mrf.mxu1 }
 0x9bf   : > { %v822_v6 = vadd.f32 %v1389_v39, %v821_v5 }
 0x9c0   : > { %v1455_v8 = vpop.f32.mrf.mxu1 }
 0x9c1   : > { %v826_v14 = vsel %vm414_vm5, %v822_v6, 0.0 }
 0x9c2   : > { %v827_v15 = vadd.f32 %v826_v14, %v825_v12 }
 0x9c4   : > { %v828_v16 = vrot.slane %v827_v15, 4 }
 0x9c6   : > { %v829_v17 = vadd.f32 %v828_v16, %v827_v15 }
 0x9c8   : > { %v830_v18 = vrot.slane %v829_v17, 2 }
 0x9ca   : > { %v831_v22 = vadd.f32 %v830_v18, %v829_v17 }
 0x9cc   : > { %v832_v23 = vrot.slane %v831_v22, 1 }
 0x9ce   : > { %v833_v24 = vadd.f32 %v832_v23, %v831_v22  ;;  %v977_v22 = vstv %s1394_s18  ;;  %s239_s18 = scalar_lea.vmem [#allocation4], %s1373_s17 }
 0x9cf   : > { %v978_v23 = vmul.f32 %v1815_v20, %v977_v22 }
 0x9d0   : > { %v834_v25 = vmul.f32 0.0625, %v833_v24 }
 0x9d2   : > { %v835_v26 = vsub.f32 %v819_v4, %v834_v25  ;;  %v836_v27 = vsub.f32 %v822_v6, %v834_v25 }
 0x9d4   : > { %v837_v28 = vmul.f32 %v835_v26, %v835_v26  ;;  %v838_v29 = vmul.f32 %v836_v27, %v836_v27 }
 0x9d6   : > { %v839_v31 = vsel %vm414_vm5, %v837_v28, 0.0  ;;  %v840_v32 = vsel %vm414_vm5, %v838_v29, 0.0 }
 0x9d7   : > { %v841_v33 = vadd.f32 %v840_v32, %v839_v31 }
 0x9d9   : > { %v842_v34 = vrot.slane %v841_v33, 4 }
 0x9db   : > { %v843_v35 = vadd.f32 %v842_v34, %v841_v33 }
 0x9dd   : > { %v844_v10 = vrot.slane %v843_v35, 2 }
 0x9df   : > { %v845_v38 = vadd.f32 %v844_v10, %v843_v35 }
 0x9e1   : > { %v846_v43 = vrot.slane %v845_v38, 1 }
 0x9e3   : > { %v847_v44 = vadd.f32 %v846_v43, %v845_v38 }
 0x9e5   : > { %v848_v45 = vmul.f32 0.0625, %v847_v44 }
 0x9e7   : > { %v849_v46 = vadd.f32 1e-05, %v848_v45 }
 0x9e9   : > { %1579 = vrsqrt.f32 %v849_v46 }
 0x9f6   : > { %v1580_v7 = vpop.eup %1579 }
 0x9f7   : > { %v851_v9 = vmul.f32 %v1580_v7, %v566_v47 }
 0x9f9   : > { %v855_v11 = vrot.slane %v851_v9, %v1834_v40 }
 0x9fb   : > { %v856_v48 = vmul.f32 %v855_v11, %v835_v26  ;;  %v857_v49 = vmul.f32 %v855_v11, %v836_v27  ;;  %v979_v26 = vmul.f32 %v1817_v21, %v977_v22 }
 0x9fd   : > { %v862_v50 = vadd.f32 %v1391_v13, %v856_v48  ;;  %v863_v51 = vadd.f32 %v1391_v13, %v857_v49 }
 0x9ff   : > { %v864_v52 = vmax.f32 %v862_v50, 0.0  ;;  %v865_v53 = vmax.f32 %v863_v51, 0.0 }
 0xa01   : > { %v871_v54 = vpack.c.bf16 %v865_v53, %v864_v52 }
 0xa03   : > { %1459 = vmatmul.mubr.msk.bf16.vlgmr.msra.gmra.mxu0 %vm414_vm5, %v871_v54 }
 0xa04   : > { %1472 = vmatprep.mubr.msk.bf16.mxu0 %vm1677_vm1, %v1676_v1 }
 0xac3   : > { %v1965_v41 = vpop.f32.mrf.mxu0 }
 0xac4   : > { %924 = vrot.lane.b32.xlu0 %v1965_v41, %s1679_s20 }
 0xac5   : > { %v1460_v55 = vpop.f32.mrf.mxu0 }
 0xac7   : > { %v1969_v56 = vpop.f32.mrf.mxu0 }
 0xac8   : > { %964 = vperm.xlu0 %1537, %v1965_v41   ;;  %926 = vrot.lane.b32.xlu1 %v1969_v56, %s1679_s20  ;;  %v1544_v57 = vpack.i.bf16 %v1969_v56, %v1965_v41  ;;  %v1079_v58 = vpack.c.bf16 %v1969_v56, %v1965_v41  ;;  %s1395_s20 = sld [smem:[#allocation3 + $0x5]] }
 0xac9   : > { %v1461_v59 = vpop.f32.mrf.mxu0 }
 0xacc   : > { %968 = vperm.xlu0 %1537, %v1969_v56   ;;  %990 = vperm.xlu1 %1543, %v1965_v41   ;;  %v1396_v41 = vld [vmem:[%s2088_s5 + $0x6] ss:$0 sm:$0xff] }
 0xace   : > { %v1003_v0 = vstv %s1395_s20  ;;  %s1404_s20 = sshll.u32 %s1743_s29, 5  ;;  %s1617_s29 = scalar_lea.vmem %s1616_s25, 64 }
 0xacf   : > { %v1004_v42 = vmul.f32 %v1815_v20, %v1003_v0  ;;  %v1005_v2 = vmul.f32 %v1817_v21, %v1003_v0  ;;  %s1296_s21 = scalar_lea.hbm %s2089_s6, %s1404_s20 }
 0xad0   : > { %994 = vperm.xlu1 %1543, %v1969_v56   ;;  %1549 = vset.pattern.permute.xlu0 %v1678_v3 }
 0xb36   : > { %v925_v60 = vpop.permute.xlu0 %924 }
 0xb37   : > { %930 = vxpose.xlu1.b32.start [1/2] (short) (narrow) %v925_v60, 8 }
 0xb3a   : > { %v927_v61 = vpop.permute.xlu1 %926 }
 0xb3b   : > { %931 = vxpose.xlu1.b32.end [2/2] (short) (narrow) %v927_v61, 8 }
 0xb43   : > { %v965_v18 = vpop.permute.xlu0 %964 }
 0xb47   : > { %v991_v62 = vpop.permute.xlu1 %990  ;;  %v969_v25 = vpop.permute.xlu0 %968 }
 0xb4b   : > { %v995_v63 = vpop.permute.xlu1 %994 }
 0xbb3   : > { %v946_v37 = vpop.trf.xlu1 }
 0xbb4   : > { %v1000_v39 = vrot.slane %v946_v37, %v1813_v19  ;;  %v974_v17 = vrot.slane %v946_v37, %v1834_v40 }
 0xbb6   : > { %v1001_v4 = vadd.f32 %v1000_v39, %v991_v62  ;;  %v1002_v5 = vadd.f32 %v1000_v39, %v995_v63  ;;  %v975_v24 = vadd.f32 %v974_v17, %v965_v18  ;;  %v976_v27 = vadd.f32 %v974_v17, %v969_v25 }
 0xbb8   : > { %v1006_v6 = vadd.f32 %v1004_v42, %v1001_v4  ;;  %v1007_v8 = vadd.f32 %v1005_v2, %v1002_v5  ;;  %v980_v28 = vadd.f32 %v978_v23, %v975_v24  ;;  %v981_v29 = vadd.f32 %v979_v26, %v976_v27 }
 0xbba   : > { %v1008_v3 = vmul.f32 0.2, %v1006_v6  ;;  %v1009_v12 = vmul.f32 0.2, %v1007_v8  ;;  %v982_v31 = vmul.f32 0.2, %v980_v28 }
 0xbbb   : > { %v983_v33 = vmul.f32 0.2, %v981_v29 }
 0xbbc   : > { %v1010_v14 = vmax.f32 %v1006_v6, %v1008_v3  ;;  %v1011_v16 = vmax.f32 %v1007_v8, %v1009_v12  ;;  %v984_v32 = vmax.f32 %v980_v28, %v982_v31 }
 0xbbd   : > { %v985_v10 = vmax.f32 %v981_v29, %v983_v33 }
 0xbbe   : > { %v1012_v15 = vsel %vm255_vm3, %v1010_v14, -1e+30  ;;  %v1013_v19 = vsel %vm256_vm4, %v1011_v16, -1e+30  ;;  %v986_v35 = vsel %vm255_vm3, %v984_v32, -1e+30 }
 0xbbf   : > { %1016 = vrot.lane.b32.xlu0 %v1012_v15, %s1681_s30  ;;  %v987_v21 = vsel %vm256_vm4, %v985_v10, -1e+30 }
 0xbc3   : > { %1018 = vrot.lane.b32.xlu0 %v1013_v19, %s1681_s30  ;;  %s1298_s30 = sshll.u32 %s239_s18, 4  ;;  %s1299_s30 = int_to_ptr.vmem [resolvable:$true] %s1298_s30 }
 0xbc4   : > { %s1611_s23 = scalar_lea.vmem %s1299_s30, 32  ;;  %p1618_p5 = scmp.lt.s32.totalorder %s1299_s30, %s1616_s25 }
 0xbc5   : > { %p1612_p2 = scmp.ne.s32.totalorder %s1299_s30, %s1611_s23  ;;  %p1619_p6 = scmp.lt.s32.totalorder %s1617_s29, %s1611_s23 }
 0xbc7   : > { %p1613_p3 = pnand %p1612_p2, %p1760_p10  ;;  %p1620_p7 = por %p1619_p6, %p1618_p5 }
 0xbc9   : > { %p1614_p4 = pneg %p1613_p3 }
 0xbcb   : > { %p1621_p8 = pnand %p1620_p7, %p1614_p4 }
 0xc31   : > { %v1017_v34 = vpop.permute.xlu0 %1016 }
 0xc32   : > { %v1022_v38 = vsel %vm414_vm5, %v986_v35, %v1017_v34 }
 0xc33   : > { %v1024_v43 = vsel %vm417_vm6, %v1022_v38, -inf }
 0xc34   : > { %1025 = vmax.xlane.f32.xlu0 %v1024_v43 }
 0xc35   : > { %v1019_v20 = vpop.permute.xlu0 %1018 }
 0xc36   : > { %v1023_v44 = vsel %vm414_vm5, %v987_v21, %v1019_v20 }
 0xc37   : > { %v1027_v45 = vsel %vm417_vm6, %v1023_v44, -inf }
 0xc38   : > { %1028 = vmax.xlane.f32.xlu1 %v1027_v45 }
 0xcbd   : > { %v1026_v46 = vpop.xlane.xlu0 %1025 }
 0xcbe   : > { %v1030_v47 = vsub.f32 %v1022_v38, %v1026_v46 }
 0xcc0   : > { %v1032_v7 = vmul.f32 1.442695, %v1030_v47 }
 0xcc1   : > { %v1029_v30 = vpop.xlane.xlu1 %1028 }
 0xcc2   : > { %1581 = vpow2.f32 %v1032_v7  ;;  %v1031_v9 = vsub.f32 %v1023_v44, %v1029_v30 }
 0xcc4   : > { %v1034_v11 = vmul.f32 1.442695, %v1031_v9 }
 0xcc6   : > { %1583 = vpow2.f32 %v1034_v11 }
 0xccf   : > { %v1582_v13 = vpop.eup %1581 }
 0xcd0   : > { %1051 = vrot.lane.b32.xlu0 %v1582_v13, %s1682_s9  ;;  %v1036_v49 = vsel %vm414_vm5, %v1582_v13, 0.0 }
 0xcd3   : > { %v1584_v48 = vpop.eup %1583 }
 0xcd4   : > { %1053 = vrot.lane.b32.xlu0 %v1584_v48, %s1682_s9  ;;  %v1039_v36 = vsel %vm414_vm5, %v1584_v48, 0.0 }
 0xcd5   : > { %1040 = vadd.xlane.f32.xlu1 %v1039_v36 }
 0xcf3   : > { %1037 = vadd.xlane.f32.xlu0 %v1036_v49 }
 0xd42   : > { %v1052_v50 = vpop.permute.xlu0 %1051 }
 0xd43   : > { %v1057_v51 = vsel %vm414_vm5, %v1052_v50, 0.0  ;;  %v1398_v50 = vld [vmem:[%s2088_s5 + $0x8] ss:$0 sm:$0xff] }
 0xd44   : > { %1058 = vadd.xlane.f32.xlu1 %v1057_v51 }
 0xd46   : > { %v1054_v52 = vpop.permute.xlu0 %1053 }
 0xd47   : > { %v1060_v53 = vsel %vm414_vm5, %v1054_v52, 0.0 }
 0xd48   : > { %1061 = vadd.xlane.f32.xlu1 %v1060_v53 }
 0xd59   : > { %1545 = vrot.lane.b32.xlu1 %v1544_v57, %s1682_s9 }
 0xd5e   : > { %v1041_v54 = vpop.xlane.xlu1 %1040 }
 0xd7c   : > { %v1038_v55 = vpop.xlane.xlu0 %1037 }
 0xd7d   : > { %1585 = vrcp.f32 %v1038_v55 }
 0xd7e   : > { %1587 = vrcp.f32 %v1041_v54 }
 0xd8a   : > { %v1586_v37 = vpop.eup %1585 }
 0xd8b   : > { %v1588_v39 = vpop.eup %1587  ;;  %v1044_v2 = vmul.f32 0.5, %v1586_v37 }
 0xd8c   : > { %v1045_v57 = vmul.f32 0.5, %v1588_v39 }
 0xd8d   : > { %v1046_v6 = vmul.f32 %v1582_v13, %v1044_v2 }
 0xd8e   : > { %v1047_v3 = vmul.f32 %v1584_v48, %v1045_v57 }
 0xd90   : > { %v1048_v15 = vpack.c.bf16 %v1047_v3, %v1046_v6 }
 0xdcd   : > { %v1059_v59 = vpop.xlane.xlu1 %1058 }
 0xdce   : > { %1589 = vrcp.f32 %v1059_v59 }
 0xdd1   : > { %v1062_v60 = vpop.xlane.xlu1 %1061 }
 0xdd2   : > { %1591 = vrcp.f32 %v1062_v60 }
 0xdd5   : > { %v1546_v61 = vpop.permute.xlu1 %1545 }
 0xdd6   : > { %v1548_v62 = vunpack.i.h.bf16 %v1546_v61  ;;  %v1547_v63 = vunpack.i.l.bf16 %v1546_v61  ;;  %v1169_v61 = vld [vmem:[%s2086_s3] sm:$0x1] }
 0xdd8   : > { %v1080_v0 = vpack.c.bf16 %v1548_v62, %v1547_v63 }
 0xdda   : > { %1463 = vmatpush3.bf16.msra.mxu1 %v1080_v0 }
 0xddb   : > { %v1590_v42 = vpop.eup %1589  ;;  %1464 = vmatprep.subr.bf16.mxu1 %v1676_v1 }
 0xddc   : > { %v1065_v4 = vmul.f32 0.5, %v1590_v42  ;;  %v1400_v42 = vld [vmem:[%s2088_s5 + $0x9] ss:$0 sm:$0xff] }
 0xdde   : > { %1465 = vmatpush3.bf16.msra.mxu1 %v1079_v58  ;;  %v1067_v12 = vmul.f32 %v1582_v13, %v1065_v4  ;;  %v869_v13 = vld [vmem:[%s2088_s5 + $0x7] sm:$0x1] }
 0xddf   : > { %v1592_v5 = vpop.eup %1591  ;;  %1476 = vmatprep.subr.bf16.mxu1 %v1676_v1 }
 0xde0   : > { %v1066_v8 = vmul.f32 0.5, %v1592_v5 }
 0xde2   : > { %v1068_v14 = vmul.f32 %v1584_v48, %v1066_v8 }
 0xde4   : > { %v1069_v16 = vpack.c.bf16 %v1068_v14, %v1067_v12 }
 0xde6   : > { %v1072_v19 = vsel %vm414_vm5, %v1048_v15, %v1069_v16 }
 0xde7   : > { %1467 = vmatmul.mubr.msk.bf16.vlgmr.msra.gmra.mxu1 %vm417_vm6, %v1072_v19 }
 0xde8   : > { %1478 = vmatprep.mubr.msk.bf16.mxu1 %vm1677_vm1, %v1676_v1 }
 0xea7   : > { %v1121_v56 = vpop.f32.mrf.mxu1 }
 0xea8   : > { %v1122_v17 = vadd.f32 %v1396_v41, %v1121_v56 }
 0xea9   : > { %v1468_v58 = vpop.f32.mrf.mxu1 }
 0xeaa   : > { %v1128_v24 = vsel %vm414_vm5, %v1122_v17, 0.0 }
 0xeab   : > { %v1124_v18 = vpop.f32.mrf.mxu1 }
 0xeac   : > { %v1125_v22 = vadd.f32 %v1396_v41, %v1124_v18 }
 0xead   : > { %v1469_v23 = vpop.f32.mrf.mxu1 }
 0xeae   : > { %v1129_v25 = vsel %vm414_vm5, %v1125_v22, 0.0 }
 0xeaf   : > { %v1130_v26 = vadd.f32 %v1129_v25, %v1128_v24 }
 0xeb1   : > { %v1131_v27 = vrot.slane %v1130_v26, 4 }
 0xeb3   : > { %v1132_v28 = vadd.f32 %v1131_v27, %v1130_v26 }
 0xeb5   : > { %v1133_v29 = vrot.slane %v1132_v28, 2 }
 0xeb7   : > { %v1134_v31 = vadd.f32 %v1133_v29, %v1132_v28 }
 0xeb9   : > { %v1135_v1 = vrot.slane %v1134_v31, 1 }
 0xebb   : > { %v1136_v32 = vadd.f32 %v1135_v1, %v1134_v31 }
 0xebd   : > { %v1137_v33 = vmul.f32 0.0625, %v1136_v32 }
 0xebf   : > { %v1138_v34 = vsub.f32 %v1122_v17, %v1137_v33  ;;  %v1139_v35 = vsub.f32 %v1125_v22, %v1137_v33 }
 0xec1   : > { %v1140_v10 = vmul.f32 %v1138_v34, %v1138_v34  ;;  %v1141_v38 = vmul.f32 %v1139_v35, %v1139_v35 }
 0xec3   : > { %v1142_v43 = vsel %vm414_vm5, %v1140_v10, 0.0  ;;  %v1143_v20 = vsel %vm414_vm5, %v1141_v38, 0.0 }
 0xec4   : > { %v1144_v21 = vadd.f32 %v1143_v20, %v1142_v43 }
 0xec6   : > { %v1145_v44 = vrot.slane %v1144_v21, 4 }
 0xec8   : > { %v1146_v45 = vadd.f32 %v1145_v44, %v1144_v21 }
 0xeca   : > { %v1147_v46 = vrot.slane %v1146_v45, 2 }
 0xecc   : > { %v1148_v47 = vadd.f32 %v1147_v46, %v1146_v45 }
 0xece   : > { %v1149_v7 = vrot.slane %v1148_v47, 1 }
 0xed0   : > { %v1150_v30 = vadd.f32 %v1149_v7, %v1148_v47 }
 0xed2   : > { %v1151_v9 = vmul.f32 0.0625, %v1150_v30 }
 0xed4   : > { %v1152_v11 = vadd.f32 1e-05, %v1151_v9 }
 0xed6   : > { %1593 = vrsqrt.f32 %v1152_v11 }
 0xee3   : > { %v1594_v48 = vpop.eup %1593 }
 0xee4   : > { %v1154_v36 = vmul.f32 %v1594_v48, %v869_v13 }
 0xee6   : > { %v1158_v49 = vrot.slane %v1154_v36, %v1834_v40  ;;  %v1552_v40 = vld [vmem:[%s2087_s4 + $0x14] sm:$0xff]  }
 0xee7   : > { %1477 = vmatpush3.bf16.msra.mxu1 %v1552_v40 }
 0xee8   : > { %v1159_v51 = vmul.f32 %v1158_v49, %v1138_v34  ;;  %v1160_v52 = vmul.f32 %v1158_v49, %v1139_v35 }
 0xeea   : > { %v1165_v53 = vadd.f32 %v1398_v50, %v1159_v51  ;;  %v1166_v54 = vadd.f32 %v1398_v50, %v1160_v52 }
 0xeec   : > { %v1167_v55 = vmax.f32 %v1165_v53, 0.0  ;;  %v1168_v59 = vmax.f32 %v1166_v54, 0.0 }
 0xeee   : > { %v1170_v60 = vpack.c.bf16 %v1168_v59, %v1167_v55 }
 0xef0   : > { %1471 = vmatpush3.bf16.msra.mxu0 %v1170_v60 }
 0xef3   : > { %1473 = vmatmul.mubr.msk.bf16.vlgmr.msra.gmra.mxu0 %vm414_vm5, %v1169_v61 }
 0xfb3   : > { %v1208_v62 = vpop.f32.mrf.mxu0 }
 0xfb4   : > { %v1217_v63 = vpack.c.bf16 %v1208_v62, %v1208_v62 }
 0xfb5   : > { %v1474_v0 = vpop.f32.mrf.mxu0 }
 0xfb6   : > { %1479 = vmatmul.mubr.msk.bf16.vlgmr.msra.gmra.mxu1 %vm414_vm5, %v1217_v63 }
 0xfb7   : > { %v1211_v37 = vpop.f32.mrf.mxu0 }
 0xfb9   : > { %v1475_v39 = vpop.f32.mrf.mxu0 }
0x1076   : > { %v1265_v2 = vpop.f32.mrf.mxu1 }
0x1077   : > { %v1266_v57 = vadd.f32 %v1400_v42, %v1265_v2 }
0x1078   : > { %v1480_v4 = vpop.f32.mrf.mxu1 }
0x1079   : > { %v1272_v5 = vsel %vm1271_vm7, %v1266_v57, -inf }
0x107a   : > { %1273 = vmax.xlane.f32.xlu0 %v1272_v5  ;;  %v1268_v6 = vpop.f32.mrf.mxu1 }
0x107c   : > { %v1481_v8 = vpop.f32.mrf.mxu1 }
0x1103   : > { %v1274_v3 = vpop.xlane.xlu0 %1273 }
0x1104   : > { %v1275_v12 = vsub.f32 %v1266_v57, %v1274_v3 }
0x1106   : > { %v1276_v14 = vmul.f32 1.442695, %v1275_v12 }
0x1108   : > { %1595 = vpow2.f32 %v1276_v14 }
0x1115   : > { %v1596_v15 = vpop.eup %1595 }
0x1116   : > { %v1278_v16 = vsel %vm1271_vm7, %v1596_v15, 0.0 }
0x1117   : > { %1279 = vadd.xlane.f32.xlu1 %v1278_v16 }
0x11a0   : > { %v1280_v19 = vpop.xlane.xlu1 %1279 }
0x11a1   : > { %1597 = vrcp.f32 %v1280_v19 }
0x11ae   : > { %v1598_v41 = vpop.eup %1597 }
0x11af   : > { %v1282_v56 = vmul.f32 %v1598_v41, %v1596_v15 }
0x11b1   : > { %1283 = vst.msk [vmem:[%s239_s18] sm:$0x3] %vm1271_vm7, %v1282_v56 }
0x11b2   : > { %1624 = shalt.err (!%p1621_p8)
}
0x11b3   : > { %s1625_s8 = scalar_lea.hbm %s1296_s21, 32  ;;  %s1629_s15 = scalar_lea.hbm %s2089_s6, 128 }
0x11b4   : > { %p1626_p9 = scmp.ne.s32.totalorder %s1296_s21, %s1625_s8  ;;  %p1630_p0 = scmp.lt.s32.totalorder %s1296_s21, %s2089_s6 }
0x11b5   : > { %p1631_p1 = scmp.lt.s32.totalorder %s1629_s15, %s1625_s8 }
0x11b6   : > { %p1627_p12 = pnand %p1626_p9, %p1760_p10 }
0x11b7   : > { %p1632_p2 = por %p1631_p1, %p1630_p0 }
0x11b8   : > { %p1628_p13 = pneg %p1627_p12 }
0x11ba   : > { %p1633_p3 = pnand %p1632_p2, %p1628_p13 }
0x11bc   : > { %1636 = shalt.err (!%p1633_p3)
}
0x11bd   : > { %1482 = dma.vmem_to_hbm [thread:$0]  (%p1760_p10), %s1299_s30, 32, %s1296_s21, %s1285_s22  }
0x11be PF: > { %p1488_p4 = scmp.ge.s32.totalorder %s1673_s28, 2  ;;  %s1310_s20 = sand.u32 1, %s1661_s26  }
0x11bf   : > { %s1311_s18 = scalar_lea.sflag [#allocation5], %s1310_s20 }
0x11c0   : > { %p1485_p5 = pnand %p1488_p4, %p1764_p11 }
0x11c2   : > { %p1486_p6 = pneg %p1485_p5 }
0x11c4   : > { %1656 = dma.done.wait (%p1486_p6), %s1311_s18, 32  }
0x11c5   : > { %1658 = vsyncadd (%p1486_p6), %s1311_s18, 4294967264  ;;  %p22_p7 = scmp.ge.s32.totalorder %s1747_s7, 6   ;;  %s2092_s26 = smov %s1665_s27 }
0x11c6   : > { %s2093_s27 = smov %s1669_s0  ;;  %s2094_s0 = smov %s1758_s10 }
0x11c7   : > { %s2095_s28 = smov %s1747_s7  ;;  %24 = sbr.rel (!%p22_p7) target bundleno = 18 (0x12), region = 79 }
0x11cc   :  { %1316 = vsyncpa [#allocation5], 1 }
0x11cd   :  { %1318 = vsyncpa [#allocation5 + $0x1], 1 }

</bundles_post_ra>
